<compile_context>
chip_gen: v7x
topology: tpu7x:2x2x1
jax: 0.10.0
libtpu: 0.0.40
codegen_flags: <defaults>
</compile_context>

<pallas_src>
import jax
import jax.numpy as jnp
from jax import lax
from jax.experimental import pallas as pl
from jax.experimental.pallas import tpu as pltpu


def basic_block_kernel(x_ref, w_ref, b_ref, out_ref):
    """One grid step processes NB images.

    x_ref  : (NB, H, W*C)      f32, lane-dense flattened NHWC images
    w_ref  : (2, 3*W*C, W*C)   bf16 banded conv weights (BN scale folded in)
    b_ref  : (2, 1, W*C)       f32 folded BatchNorm biases (tiled over W)
    out_ref: (NB, H, W*C)
    """
    NB, H, WC = x_ref.shape
    M = NB * H
    x = x_ref[...].reshape(M, WC)                       # (M, WC) f32

    # Row index modulo image height: masks the sublane rolls at image edges.
    row = lax.broadcasted_iota(jnp.int32, (M, 1), 0) % H

    def conv3x3(a, w):
        # a: (M, WC) f32, w: (3*WC, WCo) bf16.
        # 3x3 / stride-1 / pad-1 conv as ONE banded MXU matmul (K = 3*WC).
        up = pltpu.roll(a, 1, axis=0)                   # row i <- a[i-1] (wraps)
        up = jnp.where(row == 0, 0.0, up)               # zero wrapped top rows
        dn = pltpu.roll(a, M - 1, axis=0)               # row i <- a[i+1] (wraps)
        dn = jnp.where(row == H - 1, 0.0, dn)           # zero wrapped bottom rows
        lhs = jnp.concatenate([up, a, dn], axis=-1).astype(jnp.bfloat16)
        return jnp.dot(lhs, w, preferred_element_type=jnp.float32)  # (M, WCo)

    # conv1 (BN1 scale folded into weights) -> +bias1 -> relu
    y1 = jnp.maximum(conv3x3(x, w_ref[0]) + b_ref[0], 0.0)
    # conv2 (BN2 scale folded) -> +bias2 -> + identity shortcut -> relu
    y2 = conv3x3(y1, w_ref[1]) + b_ref[1] + x
    out_ref[...] = jnp.maximum(y2, 0.0).reshape(NB, H, WC).astype(out_ref.dtype)


def _fold_bn(bn, eps):
    gamma, beta, mean, var = bn
    scale = gamma / jnp.sqrt(var + eps)
    bias = beta - mean * scale
    return scale, bias


def _banded_conv_weights(w, W, scale=None):
    """(Cout, Cin, 3, 3) conv weight -> (3*W*Cin, W*Cout) banded matrix.

    Row  dy*W*Cin + jx*Cin + ci,  column  j*Cout + co  holds
    w[co, ci, dy, dx] * scale[co]  with jx = j + dx - 1 (out-of-range entries
    stay zero == width padding), so the whole 3x3 conv row structure collapses
    into a single matmul against the lane-concat [up, center, down] LHS.
    """
    Cout, Cin, KH, KW = w.shape
    if scale is not None:
        w = w * scale[:, None, None, None]
    wt = jnp.transpose(w, (2, 3, 1, 0))                       # (dy, dx, Cin, Cout)
    j = jnp.arange(W)
    dx = jnp.arange(KW)
    band = (j[None, :, None] == j[None, None, :] + dx[:, None, None] - 1)
    band = band.astype(w.dtype)                               # (dx, jx, j)
    wb = jnp.einsum('dxio,xJj->dJijo', wt, band)              # (dy, jx, Cin, j, Cout)
    return wb.reshape(KH * W * Cin, W * Cout)


def _pick_images_per_step(N, H, WC, target_m=256, act_bytes_cap=4 << 20):
    """Largest useful divisor NB of N: stop once NB*H >= target_m or VMEM cap."""
    best = 1
    for nb in range(1, N + 1):
        if N % nb:
            continue
        if nb * H * WC * 4 > act_bytes_cap:
            break
        best = nb
        if nb * H >= target_m:
            break
    return best


def basic_block_pallas(x_nchw, w1, bn1, w2, bn2, eps=1e-5):
    N, Cin, H, W = x_nchw.shape
    Cmid = w1.shape[0]
    Cout = w2.shape[0]
    assert Cin == Cmid == Cout, (
        "identity shortcut (downsample=None, reduce_first=1) requires equal channels")
    WC = W * Cin
    assert WC <= 1024, (
        "banded-conv formulation only sized for small W*C; see TODO at top of file")

    # NCHW -> (N, H, W*C); lane dim is W*C (fully dense when W*C % 128 == 0).
    x = jnp.transpose(x_nchw, (0, 2, 3, 1)).reshape(N, H, WC)

    # Fold BN into per-channel scale/bias; bake scale into the banded weights.
    s1, b1 = _fold_bn(bn1, eps)
    s2, b2 = _fold_bn(bn2, eps)
    wb1 = _banded_conv_weights(w1, W, s1).astype(jnp.bfloat16)   # (3*WC, WC)
    wb2 = _banded_conv_weights(w2, W, s2).astype(jnp.bfloat16)   # (3*WC, WC)
    wb = jnp.stack([wb1, wb2], axis=0)                           # (2, 3*WC, WC)

    # Biases tiled to the (1, W*C) lane layout (lane = j*C + c), packed as one input.
    bias = jnp.stack([jnp.tile(b1, W), jnp.tile(b2, W)], axis=0)
    bias = bias.reshape(2, 1, WC).astype(jnp.float32)

    # Batch several images per grid step so the matmul M dim is >= 256.
    NB = _pick_images_per_step(N, H, WC)
    grid = (N // NB,)

    cost = pl.CostEstimate(
        flops=2 * 2 * N * H * (3 * WC) * WC,
        transcendentals=0,
        bytes_accessed=(x.size + N * H * WC) * 4 + wb.size * 2 + bias.size * 4,
    )

    out = pl.pallas_call(
        basic_block_kernel,
        out_shape=jax.ShapeDtypeStruct((N, H, WC), x_nchw.dtype),
        grid_spec=pltpu.PrefetchScalarGridSpec(
            num_scalar_prefetch=0,
            grid=grid,
            in_specs=[
                pl.BlockSpec((NB, H, WC), lambda n: (n, 0, 0)),
                pl.BlockSpec((2, 3 * WC, WC), lambda n: (0, 0, 0)),
                pl.BlockSpec((2, 1, WC), lambda n: (0, 0, 0)),
            ],
            out_specs=pl.BlockSpec((NB, H, WC), lambda n: (n, 0, 0)),
        ),
        compiler_params=pltpu.CompilerParams(
            dimension_semantics=("parallel",)),
        cost_estimate=cost,
    )(x, wb, bias)

    return jnp.transpose(out.reshape(N, H, W, Cout), (0, 3, 1, 2))  # -> NCHW


# ---------------- pure-JAX references (for verification) ----------------
def _ref_forward_f32(x, w1, bn1, w2, bn2, eps=1e-5):
    def conv(x_, w):
        return lax.conv_general_dilated(
            x_, w, window_strides=(1, 1), padding=((1, 1), (1, 1)),
            dimension_numbers=('NCHW', 'OIHW', 'NCHW'),
            preferred_element_type=jnp.float32)

    def bn(x_, p):
        g, b, m, v = p
        g, b, m, v = (t[None, :, None, None] for t in (g, b, m, v))
        return (x_ - m) / jnp.sqrt(v + eps) * g + b

    shortcut = x
    y = jax.nn.relu(bn(conv(x, w1), bn1))
    y = bn(conv(y, w2), bn2)
    return jax.nn.relu(y + shortcut)


def _ref_forward_quant(x, w1, bn1, w2, bn2, eps=1e-5):
    # Mirrors the kernel numerics: BN scale folded into bf16 weights, bf16
    # conv operands, f32 accumulation, f32 bias/ReLU/shortcut.
    s1, b1 = _fold_bn(bn1, eps)
    s2, b2 = _fold_bn(bn2, eps)
    w1q = (w1 * s1[:, None, None, None]).astype(jnp.bfloat16)
    w2q = (w2 * s2[:, None, None, None]).astype(jnp.bfloat16)

    def conv(x_, w):
        return lax.conv_general_dilated(
            x_.astype(jnp.bfloat16), w, window_strides=(1, 1),
            padding=((1, 1), (1, 1)),
            dimension_numbers=('NCHW', 'OIHW', 'NCHW'),
            preferred_element_type=jnp.float32)

    y = jax.nn.relu(conv(x, w1q) + b1[None, :, None, None])
    y = conv(y, w2q) + b2[None, :, None, None] + x
    return jax.nn.relu(y)


if __name__ == "__main__":
    # BasicBlock(inplanes=8, planes=8, stride=1, downsample=None)
    N, C, H, W = 64, 8, 16, 16      # W*C = 128 lane-dense; NB*H = 256 per step
    inplanes = planes = C

    key = jax.random.PRNGKey(0)
    ks = jax.random.split(key, 11)

    x = jax.random.normal(ks[0], (N, C, H, W), jnp.float32)

    # conv weights: (Cout, Cin, 3, 3), bias=False
    w1 = jax.random.normal(ks[1], (planes, inplanes, 3, 3), jnp.float32) * 0.1
    w2 = jax.random.normal(ks[2], (planes, planes, 3, 3), jnp.float32) * 0.1

    # BatchNorm params (eval mode): gamma, beta, running_mean, running_var
    bn1 = (1.0 + 0.1 * jax.random.normal(ks[3], (planes,), jnp.float32),
           0.1 * jax.random.normal(ks[4], (planes,), jnp.float32),
           0.1 * jax.random.normal(ks[5], (planes,), jnp.float32),
           1.0 + 0.1 * jax.random.uniform(ks[6], (planes,), jnp.float32))
    bn2 = (1.0 + 0.1 * jax.random.normal(ks[7], (planes,), jnp.float32),
           0.1 * jax.random.normal(ks[8], (planes,), jnp.float32),
           0.1 * jax.random.normal(ks[9], (planes,), jnp.float32),
           1.0 + 0.1 * jax.random.uniform(ks[10], (planes,), jnp.float32))

    # TODO(synk): drop_block / drop_path / se / aa / downsample are None in
    # this configuration and therefore not implemented.

    out = jax.block_until_ready(jax.jit(basic_block_pallas)(x, w1, bn1, w2, bn2))

    ref_q = jax.block_until_ready(_ref_forward_quant(x, w1, bn1, w2, bn2))
    ref_f32 = jax.block_until_ready(_ref_forward_f32(x, w1, bn1, w2, bn2))

    assert out.shape == (N, C, H, W)
    # Tight check vs a reference with the same bf16-weight / f32-accum numerics.
    assert jnp.allclose(out, ref_q, atol=5e-3, rtol=5e-3), (
        f"max err vs quantized ref {jnp.max(jnp.abs(out - ref_q))}")
    # Loose check vs the all-f32 reference (MXU operands are bf16).
    assert jnp.allclose(out, ref_f32, atol=5e-2, rtol=5e-2), (
        f"max err vs f32 ref {jnp.max(jnp.abs(out - ref_f32))}")
    print("KERNEL_OK")
</pallas_src>

<mosaic_0001>
module attributes {stable_mosaic.version = 11 : i64} {
  func.func @basic_block_kernel(%arg0: i32, %arg1: memref<16x16x128xf32, #tpu.memory_space<vmem>>, %arg2: memref<2x384x128xbf16, #tpu.memory_space<vmem>>, %arg3: memref<2x1x128xf32, #tpu.memory_space<vmem>>, %arg4: memref<16x16x128xf32, #tpu.memory_space<vmem>>) attributes {dimension_semantics = [#tpu.dimension_semantics<parallel>], iteration_bounds = array<i64: 4>, scalar_prefetch = 0 : i64, scratch_operands = 0 : i64, tpu.core_type = #tpu.core_type<tc>, window_params = [{transform_indices = @transform_0, window_bounds = array<i64: 16, 16, 128>}, {pipeline_mode = #tpu.pipeline_mode<synchronous>, transform_indices = @transform_1, window_bounds = array<i64: 2, 384, 128>}, {pipeline_mode = #tpu.pipeline_mode<synchronous>, transform_indices = @transform_2, window_bounds = array<i64: 2, 1, 128>}, {transform_indices = @transform_3, window_bounds = array<i64: 16, 16, 128>}]} {
    %c0 = arith.constant 0 : index
    %c0_0 = arith.constant 0 : index
    %c0_1 = arith.constant 0 : index
    %0 = vector.load %arg1[%c0, %c0_0, %c0_1] : memref<16x16x128xf32, #tpu.memory_space<vmem>>, vector<16x16x128xf32>
    %1 = vector.shape_cast %0 : vector<16x16x128xf32> to vector<256x128xf32>
    %2 = tpu.iota {dimensions = array<i32: 0>} : vector<256x1xi32>
    %c16_i32 = arith.constant 16 : i32
    %c0_i32 = arith.constant 0 : i32
    %3 = arith.cmpi eq, %c16_i32, %c0_i32 : i32
    %c1_i32 = arith.constant 1 : i32
    %4 = arith.select %3, %c1_i32, %c16_i32 : i32
    %5 = vector.broadcast %4 : i32 to vector<256x1xi32>
    %6 = arith.remsi %2, %5 : vector<256x1xi32>
    %c0_i32_2 = arith.constant 0 : i32
    %7 = vector.broadcast %c0_i32_2 : i32 to vector<256x1xi32>
    %8 = arith.cmpi ne, %6, %7 : vector<256x1xi32>
    %c0_i32_3 = arith.constant 0 : i32
    %9 = vector.broadcast %c0_i32_3 : i32 to vector<256x1xi32>
    %10 = arith.cmpi slt, %6, %9 : vector<256x1xi32>
    %c0_i32_4 = arith.constant 0 : i32
    %11 = arith.cmpi slt, %4, %c0_i32_4 : i32
    %12 = vector.broadcast %11 : i1 to vector<256x1xi1>
    %13 = vector.broadcast %12 : vector<256x1xi1> to vector<256x1xi1>
    %14 = arith.xori %10, %13 : vector<256x1xi1>
    %15 = arith.andi %14, %8 : vector<256x1xi1>
    %16 = vector.broadcast %4 : i32 to vector<256x1xi32>
    %17 = arith.addi %6, %16 : vector<256x1xi32>
    %18 = arith.select %15, %17, %6 : vector<256x1xi1>, vector<256x1xi32>
    %c0_5 = arith.constant 0 : index
    %c0_6 = arith.constant 0 : index
    %c0_7 = arith.constant 0 : index
    %19 = vector.load %arg2[%c0_5, %c0_6, %c0_7] : memref<2x384x128xbf16, #tpu.memory_space<vmem>>, vector<1x384x128xbf16>
    %20 = vector.shape_cast %19 : vector<1x384x128xbf16> to vector<384x128xbf16>
    %c1_i32_8 = arith.constant 1 : i32
    %21 = tpu.dynamic_rotate %1 by %c1_i32_8 dim 0 : vector<256x128xf32>, i32 -> vector<256x128xf32>
    %c0_i32_9 = arith.constant 0 : i32
    %22 = vector.broadcast %c0_i32_9 : i32 to vector<256x1xi32>
    %23 = arith.cmpi eq, %18, %22 : vector<256x1xi32>
    %cst = arith.constant 0.000000e+00 : f32
    %24 = vector.shape_cast %23 : vector<256x1xi1> to vector<256x1xi1>
    %25 = vector.broadcast %24 : vector<256x1xi1> to vector<256x128xi1>
    %26 = vector.broadcast %cst : f32 to vector<256x128xf32>
    %27 = arith.select %25, %26, %21 : vector<256x128xi1>, vector<256x128xf32>
    %c255_i32 = arith.constant 255 : i32
    %28 = tpu.dynamic_rotate %1 by %c255_i32 dim 0 : vector<256x128xf32>, i32 -> vector<256x128xf32>
    %c15_i32 = arith.constant 15 : i32
    %29 = vector.broadcast %c15_i32 : i32 to vector<256x1xi32>
    %30 = arith.cmpi eq, %18, %29 : vector<256x1xi32>
    %cst_10 = arith.constant 0.000000e+00 : f32
    %31 = vector.shape_cast %30 : vector<256x1xi1> to vector<256x1xi1>
    %32 = vector.broadcast %31 : vector<256x1xi1> to vector<256x128xi1>
    %33 = vector.broadcast %cst_10 : f32 to vector<256x128xf32>
    %34 = arith.select %32, %33, %28 : vector<256x128xi1>, vector<256x128xf32>
    %35 = tpu.concatenate %27, %1, %34 in 1 : vector<256x128xf32>, vector<256x128xf32>, vector<256x128xf32> -> vector<256x384xf32>
    %36 = arith.truncf %35 : vector<256x384xf32> to vector<256x384xbf16>
    %cst_11 = arith.constant dense<0.000000e+00> : vector<256x128xf32>
    %37 = tpu.matmul %36, %20, %cst_11 {dimension_numbers = #tpu.dot_dimension_numbers<[1], [0], [0], [1], [0, 0, 1, 1], [], []>} : vector<256x384xbf16>, vector<384x128xbf16>, vector<256x128xf32> -> vector<256x128xf32>
    %c0_12 = arith.constant 0 : index
    %c0_13 = arith.constant 0 : index
    %c0_14 = arith.constant 0 : index
    %38 = vector.load %arg3[%c0_12, %c0_13, %c0_14] : memref<2x1x128xf32, #tpu.memory_space<vmem>>, vector<1x1x128xf32>
    %39 = vector.shape_cast %38 : vector<1x1x128xf32> to vector<1x128xf32>
    %40 = vector.broadcast %39 : vector<1x128xf32> to vector<256x128xf32>
    %41 = arith.addf %37, %40 : vector<256x128xf32>
    %cst_15 = arith.constant 0.000000e+00 : f32
    %42 = vector.broadcast %cst_15 : f32 to vector<256x128xf32>
    %43 = arith.maximumf %41, %42 : vector<256x128xf32>
    %c1 = arith.constant 1 : index
    %c0_16 = arith.constant 0 : index
    %c0_17 = arith.constant 0 : index
    %44 = vector.load %arg2[%c1, %c0_16, %c0_17] : memref<2x384x128xbf16, #tpu.memory_space<vmem>>, vector<1x384x128xbf16>
    %45 = vector.shape_cast %44 : vector<1x384x128xbf16> to vector<384x128xbf16>
    %c1_i32_18 = arith.constant 1 : i32
    %46 = tpu.dynamic_rotate %43 by %c1_i32_18 dim 0 : vector<256x128xf32>, i32 -> vector<256x128xf32>
    %c0_i32_19 = arith.constant 0 : i32
    %47 = vector.broadcast %c0_i32_19 : i32 to vector<256x1xi32>
    %48 = arith.cmpi eq, %18, %47 : vector<256x1xi32>
    %cst_20 = arith.constant 0.000000e+00 : f32
    %49 = vector.shape_cast %48 : vector<256x1xi1> to vector<256x1xi1>
    %50 = vector.broadcast %49 : vector<256x1xi1> to vector<256x128xi1>
    %51 = vector.broadcast %cst_20 : f32 to vector<256x128xf32>
    %52 = arith.select %50, %51, %46 : vector<256x128xi1>, vector<256x128xf32>
    %c255_i32_21 = arith.constant 255 : i32
    %53 = tpu.dynamic_rotate %43 by %c255_i32_21 dim 0 : vector<256x128xf32>, i32 -> vector<256x128xf32>
    %c15_i32_22 = arith.constant 15 : i32
    %54 = vector.broadcast %c15_i32_22 : i32 to vector<256x1xi32>
    %55 = arith.cmpi eq, %18, %54 : vector<256x1xi32>
    %cst_23 = arith.constant 0.000000e+00 : f32
    %56 = vector.shape_cast %55 : vector<256x1xi1> to vector<256x1xi1>
    %57 = vector.broadcast %56 : vector<256x1xi1> to vector<256x128xi1>
    %58 = vector.broadcast %cst_23 : f32 to vector<256x128xf32>
    %59 = arith.select %57, %58, %53 : vector<256x128xi1>, vector<256x128xf32>
    %60 = tpu.concatenate %52, %43, %59 in 1 : vector<256x128xf32>, vector<256x128xf32>, vector<256x128xf32> -> vector<256x384xf32>
    %61 = arith.truncf %60 : vector<256x384xf32> to vector<256x384xbf16>
    %cst_24 = arith.constant dense<0.000000e+00> : vector<256x128xf32>
    %62 = tpu.matmul %61, %45, %cst_24 {dimension_numbers = #tpu.dot_dimension_numbers<[1], [0], [0], [1], [0, 0, 1, 1], [], []>} : vector<256x384xbf16>, vector<384x128xbf16>, vector<256x128xf32> -> vector<256x128xf32>
    %c1_25 = arith.constant 1 : index
    %c0_26 = arith.constant 0 : index
    %c0_27 = arith.constant 0 : index
    %63 = vector.load %arg3[%c1_25, %c0_26, %c0_27] : memref<2x1x128xf32, #tpu.memory_space<vmem>>, vector<1x1x128xf32>
    %64 = vector.shape_cast %63 : vector<1x1x128xf32> to vector<1x128xf32>
    %65 = vector.broadcast %64 : vector<1x128xf32> to vector<256x128xf32>
    %66 = arith.addf %62, %65 : vector<256x128xf32>
    %67 = arith.addf %66, %1 : vector<256x128xf32>
    %cst_28 = arith.constant 0.000000e+00 : f32
    %68 = vector.broadcast %cst_28 : f32 to vector<256x128xf32>
    %69 = arith.maximumf %67, %68 : vector<256x128xf32>
    %70 = vector.shape_cast %69 : vector<256x128xf32> to vector<16x16x128xf32>
    %c0_29 = arith.constant 0 : index
    %c0_30 = arith.constant 0 : index
    %c0_31 = arith.constant 0 : index
    %71 = vector.load %arg4[%c0_29, %c0_30, %c0_31] : memref<16x16x128xf32, #tpu.memory_space<vmem>>, vector<16x16x128xf32>
    tpu.vector_store %arg4[%c0_29, %c0_30, %c0_31], %70 {strides = array<i32>} : memref<16x16x128xf32, #tpu.memory_space<vmem>>, vector<16x16x128xf32>,
    return
  }
  func.func @transform_0(%arg0: i32) -> (i32, i32, i32) {
    %c0_i32 = arith.constant 0 : i32
    %c0_i32_0 = arith.constant 0 : i32
    %c0_i32_1 = arith.constant 0 : i32
    return %arg0, %c0_i32, %c0_i32_0 : i32, i32, i32
  }
  func.func @transform_1(%arg0: i32) -> (i32, i32, i32) {
    %c0_i32 = arith.constant 0 : i32
    %c0_i32_0 = arith.constant 0 : i32
    %c0_i32_1 = arith.constant 0 : i32
    %c0_i32_2 = arith.constant 0 : i32
    return %c0_i32, %c0_i32_0, %c0_i32_1 : i32, i32, i32
  }
  func.func @transform_2(%arg0: i32) -> (i32, i32, i32) {
    %c0_i32 = arith.constant 0 : i32
    %c0_i32_0 = arith.constant 0 : i32
    %c0_i32_1 = arith.constant 0 : i32
    %c0_i32_2 = arith.constant 0 : i32
    return %c0_i32, %c0_i32_0, %c0_i32_1 : i32, i32, i32
  }
  func.func @transform_3(%arg0: i32) -> (i32, i32, i32) {
    %c0_i32 = arith.constant 0 : i32
    %c0_i32_0 = arith.constant 0 : i32
    %c0_i32_1 = arith.constant 0 : i32
    return %arg0, %c0_i32, %c0_i32_0 : i32, i32, i32
  }
}

</mosaic_0001>

<bundles_post_ra>
// kernel: tile.13
= control target key start
LH: loop header
LB: loop body
LE: loop exit
PB: predicated region body
PF: predicated region fallthrough
CT: control target
= control target key end

     0   :  { %s28_s0 = inlined_call_operand.vmem [shape: f32[8], index: 0, kind: input, shape index: {}]   ;;  %s29_s1 = inlined_call_operand.vmem [shape: f32[16,8], index: 1, kind: output, shape index: {}]  }
   0x1   :  { %v4_v0 = vld [vmem:[%s28_s0] ss:$0 sm:$0xff] }
   0x2   :  { %5 = vst [vmem:[%s29_s1] sm:$0xff] %v4_v0  ;;  %8 = vst [vmem:[%s29_s1 + $0x8] sm:$0xff] %v4_v0 }

// kernel: tile.18
= control target key start
LH: loop header
LB: loop body
LE: loop exit
PB: predicated region body
PF: predicated region fallthrough
CT: control target
= control target key end

     0   :  { %s131_s10 = smov 120   ;;  %s132_s11 = smov 104   ;;  %vm3_vm0 = vcmask 64512   ;;  %vm9_vm1 = vcmask 1048512   ;;  %vm15_vm2 = vcmask 982912   ;;  %vm21_vm3 = vcmask 917312   ;;  %s207_s0 = inlined_call_operand.vmem [shape: f32[16,8], index: 0, kind: input, shape index: {}]   ;;  %s208_s1 = inlined_call_operand.vmem [shape: f32[1,128], index: 1, kind: output, shape index: {}]  }
   0x1   :  { %v101_v0 = vld [vmem:[%s207_s0 + $0xf] sm:$0x1]   ;;  %v103_v1 = vld [vmem:[%s207_s0 + $0xd] sm:$0x1]   ;;  %v102_v2 = vld [vmem:[%s207_s0 + $0xe] sm:$0x1]  }
   0x2   :  { %7 = vrot.lane.b32.xlu0 %v101_v0, %s131_s10  ;;  %19 = vrot.lane.b32.xlu1 %v103_v1, %s132_s11  ;;  %v104_v3 = vld [vmem:[%s207_s0 + $0xc] sm:$0x1]   ;;  %s133_s16 = smov 112   ;;  %s134_s17 = smov 96   ;;  %v105_v4 = vld [vmem:[%s207_s0 + $0xb] sm:$0x1]  }
   0x3   :  { %v106_v5 = vld [vmem:[%s207_s0 + $0xa] sm:$0x1]   ;;  %v2_v6 = vld [vmem:[%s207_s0] sm:$0x1]   ;;  %s135_s24 = smov 88   ;;  %s136_s25 = smov 80  }
   0x4   :  { %4 = vst.msk [vmem:[#allocation0] sm:$0x1] %vm3_vm0, %v2_v6   ;;  %v107_v7 = vld [vmem:[%s207_s0 + $0x9] sm:$0x1]   ;;  %v108_v8 = vld [vmem:[%s207_s0 + $0x8] sm:$0x1]  }
   0x5   :  { %s137_s30 = smov 72   ;;  %s138_s2 = smov 64   ;;  %v109_v9 = vld [vmem:[%s207_s0 + $0x7] sm:$0x1]   ;;  %v110_v10 = vld [vmem:[%s207_s0 + $0x6] sm:$0x1]  }
   0x6   :  { %13 = vrot.lane.b32.xlu0 %v102_v2, %s133_s16  ;;  %25 = vrot.lane.b32.xlu1 %v104_v3, %s134_s17  ;;  %s139_s7 = smov 56   ;;  %s140_s8 = smov 48   ;;  %v111_v11 = vld [vmem:[%s207_s0 + $0x5] sm:$0x1]   ;;  %v112_v12 = vld [vmem:[%s207_s0 + $0x4] sm:$0x1]  }
   0x7   :  { %s141_s13 = smov 40   ;;  %s142_s14 = smov 32   ;;  %v113_v13 = vld [vmem:[%s207_s0 + $0x3] sm:$0x1]   ;;  %v114_v14 = vld [vmem:[%s207_s0 + $0x2] sm:$0x1]  }
   0x8   :  { %s143_s19 = smov 24   ;;  %s144_s20 = smov 16   ;;  %v115_v15 = vld [vmem:[%s207_s0 + $0x1] sm:$0x1]   ;;  %vm27_vm4 = vcmask 851712   ;;  %vm33_vm5 = vcmask 786112  }
   0x9   :  { %s145_s0 = smov 8   ;;  %vm39_vm6 = vcmask 720512   ;;  %vm45_vm7 = vcmask 654912   ;;  %vm51_vm8 = vcmask 589312   ;;  %vm57_vm9 = vcmask 523712  }
   0xa   :  { %31 = vrot.lane.b32.xlu0 %v105_v4, %s135_s24  ;;  %37 = vrot.lane.b32.xlu1 %v106_v5, %s136_s25  ;;  %vm63_vm10 = vcmask 458112   ;;  %vm69_vm11 = vcmask 392512   ;;  %vm75_vm12 = vcmask 326912   ;;  %vm81_vm13 = vcmask 261312  }
   0xb   :  { %vm87_vm14 = vcmask 195712   ;;  %vm93_vm15 = vcmask 130112  }
   0xe   :  { %43 = vrot.lane.b32.xlu0 %v107_v7, %s137_s30  ;;  %49 = vrot.lane.b32.xlu1 %v108_v8, %s138_s2 }
  0x12   :  { %55 = vrot.lane.b32.xlu0 %v109_v9, %s139_s7  ;;  %61 = vrot.lane.b32.xlu1 %v110_v10, %s140_s8 }
  0x16   :  { %67 = vrot.lane.b32.xlu0 %v111_v11, %s141_s13  ;;  %73 = vrot.lane.b32.xlu1 %v112_v12, %s142_s14 }
  0x1a   :  { %79 = vrot.lane.b32.xlu0 %v113_v13, %s143_s19  ;;  %85 = vrot.lane.b32.xlu1 %v114_v14, %s144_s20 }
  0x1e   :  { %91 = vrot.lane.b32.xlu0 %v115_v15, %s145_s0 }
  0x74   :  { %v8_v16 = vpop.permute.xlu0 %7   ;;  %v20_v17 = vpop.permute.xlu1 %19  }
  0x75   :  { %10 = vst.msk [vmem:[#allocation0] sm:$0x1] %vm9_vm1, %v8_v16  }
  0x78   :  { %v14_v18 = vpop.permute.xlu0 %13   ;;  %v26_v19 = vpop.permute.xlu1 %25  }
  0x79   :  { %16 = vst.msk [vmem:[#allocation0] sm:$0x1] %vm15_vm2, %v14_v18  }
  0x7a   :  { %22 = vst.msk [vmem:[#allocation0] sm:$0x1] %vm21_vm3, %v20_v17  }
  0x7b   :  { %28 = vst.msk [vmem:[#allocation0] sm:$0x1] %vm27_vm4, %v26_v19  }
  0x7c   :  { %v32_v20 = vpop.permute.xlu0 %31   ;;  %v38_v21 = vpop.permute.xlu1 %37  }
  0x7d   :  { %34 = vst.msk [vmem:[#allocation0] sm:$0x1] %vm33_vm5, %v32_v20  }
  0x7e   :  { %40 = vst.msk [vmem:[#allocation0] sm:$0x1] %vm39_vm6, %v38_v21  }
  0x80   :  { %v44_v22 = vpop.permute.xlu0 %43   ;;  %v50_v23 = vpop.permute.xlu1 %49  }
  0x81   :  { %46 = vst.msk [vmem:[#allocation0] sm:$0x1] %vm45_vm7, %v44_v22  }
  0x82   :  { %52 = vst.msk [vmem:[#allocation0] sm:$0x1] %vm51_vm8, %v50_v23  }
  0x84   :  { %v56_v24 = vpop.permute.xlu0 %55   ;;  %v62_v25 = vpop.permute.xlu1 %61  }
  0x85   :  { %58 = vst.msk [vmem:[#allocation0] sm:$0x1] %vm57_vm9, %v56_v24  }
  0x86   :  { %64 = vst.msk [vmem:[#allocation0] sm:$0x1] %vm63_vm10, %v62_v25  }
  0x88   :  { %v68_v26 = vpop.permute.xlu0 %67   ;;  %v74_v27 = vpop.permute.xlu1 %73  }
  0x89   :  { %70 = vst.msk [vmem:[#allocation0] sm:$0x1] %vm69_vm11, %v68_v26  }
  0x8a   :  { %76 = vst.msk [vmem:[#allocation0] sm:$0x1] %vm75_vm12, %v74_v27  }
  0x8c   :  { %v80_v28 = vpop.permute.xlu0 %79   ;;  %v86_v29 = vpop.permute.xlu1 %85  }
  0x8d   :  { %82 = vst.msk [vmem:[#allocation0] sm:$0x1] %vm81_vm13, %v80_v28  }
  0x8e   :  { %88 = vst.msk [vmem:[#allocation0] sm:$0x1] %vm87_vm14, %v86_v29  }
  0x90   :  { %v92_v30 = vpop.permute.xlu0 %91  }
  0x91   :  { %94 = vst.msk [vmem:[#allocation0] sm:$0x1] %vm93_vm15, %v92_v30  }
  0x98   :  { %v98_v31 = vld [vmem:[#allocation0] sm:$0x1] }
  0x99   :  { %100 = vst [vmem:[%s208_s1] sm:$0x1] %v98_v31 }

// kernel: basic_block_pallas.1
= control target key start
LH: loop header
LB: loop body
LE: loop exit
PB: predicated region body
PF: predicated region fallthrough
CT: control target
= control target key end

     0   :  { %s3421_s12 = smov 0   ;;  %s5012_s0 = inlined_call_operand.vmem [shape: f32[64,16,128], index: 0, kind: input, shape index: {}]   ;;  %s5013_s1 = inlined_call_operand.vmem [shape: bf16[2,384,128], index: 1, kind: input, shape index: {}]   ;;  %s5014_s2 = inlined_call_operand.vmem [shape: f32[2,1,128], index: 2, kind: input, shape index: {}]   ;;  %s5015_s3 = inlined_call_operand.vmem [shape: f32[64,16,128], index: 3, kind: output, shape index: {}]  }
   0x1 LB: > { %s2533_s13 = sadd.s32 4294967295, %s3398_s12   ;;  %p2537_p0 = scmp.ge.s32.totalorder %s3398_s12, 1  ;;  %s3398_s12 = sphi %s3421_s12, %s13_s12  }
   0x2   : > { %p139_p1 = scmp.lt.s32.totalorder %s3398_s12, 5 }
   0x4   : > { %p140_p2 = pnand %p2537_p0, %p139_p1 }
   0x6   : > { %143 = sbr.rel (%p140_p2) target bundleno = 740 (0x2e4), region = 32 }
   0xd   : > { %v3312_v0 = vld [vmem:[%s5013_s1 + $0x40] sm:$0xff]   ;;  %v3314_v2 = vld [vmem:[%s5013_s1 + $0x48] sm:$0xff]   ;;  %v3317_v5 = vld [vmem:[%s5013_s1 + $0x50] sm:$0xff]   ;;  %s2538_s28 = sshll.u32 %s2533_s13, 4  ;;  %v212_v11 = vlaneseq  ;;  %vm3400_vm4 = vmmov 1  }
   0xe   : > { %v3313_v1 = vld [vmem:[%s5013_s1] sm:$0xff]   ;;  %2935 = vmatprep.subr.bf16.mxu0 %v3312_v0  ;;  %v3316_v4 = vld [vmem:[%s5013_s1 + $0x8] sm:$0xff]   ;;  %v3319_v7 = vld [vmem:[%s5013_s1 + $0x10] sm:$0xff]   ;;  %p166_p3 = scmp.lt.s32.totalorder %s2538_s28, 63 }
   0xf   : > { %2936 = vmatpush3.bf16.msra.mxu0 %v3313_v1  ;;  %v3315_v3 = vld [vmem:[%s5013_s1 + $0x80] sm:$0xff]   ;;  %v3318_v6 = vld [vmem:[%s5013_s1 + $0x88] sm:$0xff]   ;;  %v3320_v8 = vld [vmem:[%s5013_s1 + $0x58] sm:$0xff]   ;;  %v3473_v15 = vshrl.u32 %v212_v11, 7  ;;  %v5080_v1 = vmov 0 }
  0x10   : > { %2937 = vmatprep.subr.bf16.mxu0 %v3314_v2  ;;  %3207 = vmatprep.subr.bf16.mxu1 %v3315_v3  ;;  %v3321_v9 = vld [vmem:[%s5013_s1 + $0x90] sm:$0xff]   ;;  %v3322_v10 = vld [vmem:[%s5013_s1 + $0x18] sm:$0xff]   ;;  %v3323_v12 = vld [vmem:[%s5013_s1 + $0x60] sm:$0xff]   ;;  %s5344_s28 = smov (!%p166_p3, %s2538_s28), 63 }
  0x11   : > { %3208 = vmatpush3.bf16.msra.mxu1 %v3315_v3  ;;  %v3324_v13 = vld [vmem:[%s5013_s1 + $0x98] sm:$0xff]   ;;  %v3325_v14 = vld [vmem:[%s5013_s1 + $0x20] sm:$0xff]   ;;  %v3326_v17 = vld [vmem:[%s5013_s1 + $0x68] sm:$0xff]   ;;  %s2901_s21 = sshll.u32 %s5344_s28, 4  ;;  %v214_v19 = vadd.s32 8, %v3473_v15  ;;  %v249_v22 = vand.u32 15, %v3473_v15 }
  0x12   : > { %3209 = vmatprep.subr.bf16.mxu1 %v3318_v6  ;;  %v3327_v16 = vld [vmem:[%s5013_s1 + $0xa0] sm:$0xff]   ;;  %v3328_v18 = vld [vmem:[%s5013_s1 + $0x28] sm:$0xff]   ;;  %v3329_v21 = vld [vmem:[%s5013_s1 + $0x70] sm:$0xff]   ;;  %s3497_s4 = scalar_lea.vmem %s5012_s0, %s2901_s21  ;;  %vm5017_vm0 = vcmp.lt.s32.totalorder %v3473_v15, 1  ;;  %vm5018_vm1 = vcmp.lt.s32.totalorder %v3473_v15, 7  ;;  %v216_v29 = vadd.s32 24, %v3473_v15  ;;  %s4885_s25 = scalar_lea.vmem %s5015_s3, %s2901_s21 }
  0x13   : > { %2938 = vmatpush3.bf16.msra.mxu0 %v3316_v4  ;;  %v3330_v20 = vld [vmem:[%s5013_s1 + $0xa8] sm:$0xff]   ;;  %v3331_v23 = vld [vmem:[%s5013_s1 + $0x30] sm:$0xff]   ;;  %v256_v25 = vand.u32 15, %v214_v19  ;;  %v3508_v26 = vld [vmem:[%s3497_s4] sm:$0xff]  ;;  %v218_v30 = vadd.s32 40, %v3473_v15  ;;  %vm3527_vm2 = vcmp.ne.s32.totalorder %v249_v22, 0 }
  0x14   : > { %2939 = vmatprep.subr.bf16.mxu0 %v3317_v5  ;;  %v3333_v24 = vld [vmem:[%s5013_s1 + $0xb0] sm:$0xff]   ;;  %v3511_v27 = vld [vmem:[%s3497_s4 + $0x8] sm:$0xff]  ;;  %v3514_v28 = vld [vmem:[%s3497_s4 + $0xf8] sm:$0xff]  ;;  %v677_v32 = vrot.slane %v3508_v26, 7  ;;  %v870_v38 = vrot.slane %v3508_v26, 1  ;;  %v270_v49 = vand.u32 15, %v216_v29 }
  0x15   : > { %3210 = vmatpush3.bf16.msra.mxu1 %v3318_v6  ;;  %v3332_v31 = vld [vmem:[%s5013_s1 + $0x78] sm:$0xff]   ;;  %v678_v33 = vrot.slane %v3511_v27, 7  ;;  %v1064_v34 = vpack.c.bf16 %v3511_v27, %v3508_v26  ;;  %v708_v35 = vrot.slane %v3514_v28, 7  ;;  %v182_v37 = vld [vmem:[%s3497_s4 + $0x10] sm:$0xff]  ;;  %v871_v39 = vrot.slane %v3511_v27, 1  ;;  %v3548_v45 = vld [vmem:[%s3497_s4 + $0x20] sm:$0xff] }
  0x16   : > { %3211 = vmatprep.subr.bf16.mxu1 %v3321_v9  ;;  %v872_v42 = vrot.slane %v182_v37, 1  ;;  %vm3540_vm3 = vcmp.ne.s32.totalorder %v256_v25, 15  ;;  %v3545_v44 = vld [vmem:[%s3497_s4 + $0x18] sm:$0xff]  ;;  %v874_v51 = vrot.slane %v3548_v45, 1  ;;  %v215_v53 = vadd.s32 16, %v3473_v15  ;;  %v3566_v54 = vld [vmem:[%s3497_s4 + $0x30] sm:$0xff]  ;;  %vm3587_vm6 = vmpackc.low %vm3400_vm4, %vm3527_vm2 }
  0x17   : > { %2940 = vmatpush3.bf16.msra.mxu0 %v3319_v7  ;;  %1294 = vmatprep.mubr.bf16.mxu0 %v1064_v34  ;;  %v740_v40 = vsel %vm5017_vm0, %v677_v32, %v678_v33  ;;  %v741_v41 = vsel %vm5017_vm0, %v708_v35, %v677_v32  ;;  %v3334_v46 = vld [vmem:[%s5013_s1 + $0x38] sm:$0xff]   ;;  %v933_v48 = vsel %vm5018_vm1, %v870_v38, %v871_v39  ;;  %v873_v50 = vrot.slane %v3545_v44, 1  ;;  %vm3571_vm5 = vmpackc.low %vm3540_vm3, %vm3400_vm4  ;;  %v3576_v60 = vld [vmem:[%s3497_s4 + $0x28] sm:$0xff] }
  0x18   : > { %2941 = vmatprep.subr.bf16.mxu0 %v3320_v8  ;;  %v3335_v47 = vld [vmem:[%s5013_s1 + $0xb8] sm:$0xff]   ;;  %v932_v52 = vsel %vm5018_vm1, %v871_v39, %v872_v42  ;;  %v284_v55 = vand.u32 15, %v218_v30  ;;  %v2571_v56 = vpack.c.bf16 %v740_v40, %v741_v41  ;;  %v679_v59 = vrot.slane %v182_v37, 7  ;;  %v3601_v6 = vld [vmem:[%s3497_s4 + $0x40] sm:$0xff]  ;;  %v3634_v22 = vld [vmem:[%s3497_s4 + $0x50] sm:$0xff] }
  0x19   : > { %3212 = vmatpush3.bf16.msra.mxu1 %v3321_v9  ;;  %v2635_v58 = vpack.c.bf16 %v932_v52, %v933_v48  ;;  %v930_v61 = vsel %vm5018_vm1, %v873_v50, %v874_v51  ;;  %v931_v62 = vsel %vm5018_vm1, %v872_v42, %v873_v50  ;;  %v680_v63 = vrot.slane %v3545_v44, 7  ;;  %v3598_v5 = vld [vmem:[%s3497_s4 + $0x38] sm:$0xff]  ;;  %v3336_v39 = vld [vmem:[%s5013_s1 + $0x140] sm:$0xff]  }
  0x1a   : > { %3213 = vmatprep.subr.bf16.mxu1 %v3324_v13  ;;  %v875_v0 = vrot.slane %v3576_v60, 1  ;;  %v5081_v1 = vsel %vm3587_vm6, 4294967295, %v5080_v1  ;;  %vm3591_vm7 = vcmp.ne.s32.totalorder %v270_v49, 15  ;;  %v1067_v3 = vpack.c.bf16 %v3545_v44, %v182_v37  ;;  %v3658_v37 = vld [vmem:[%s3497_s4 + $0x60] sm:$0xff] }
  0x1b   : > { %2942 = vmatpush3.bf16.msra.mxu0 %v3322_v10  ;;  %v876_v4 = vrot.slane %v3566_v54, 1  ;;  %v220_v7 = vadd.s32 56, %v3473_v15  ;;  %3223 = vmatprep.mubr.msk.bf16.mxu1 %vm3571_vm5, %v2635_v58  ;;  %v263_v8 = vand.u32 15, %v215_v53  ;;  %vm2921_vm8 = vcmp.ne.s32.totalorder %v284_v55, 15  ;;  %vm3617_vm9 = vmpackc.low %vm3591_vm7, %vm3400_vm4  ;;  %v3698_v58 = vld [vmem:[%s3497_s4 + $0x68] sm:$0xff] }
  0x1c   : > { %2943 = vmatprep.subr.bf16.mxu0 %v3323_v12  ;;  %v929_v9 = vsel %vm5018_vm1, %v874_v51, %v875_v0  ;;  %v2639_v10 = vpack.c.bf16 %v930_v61, %v931_v62  ;;  %v739_v11 = vsel %vm5017_vm0, %v678_v33, %v679_v59  ;;  %vm3626_vm10 = vmpackc.low %vm2921_vm8, %vm3400_vm4  ;;  %v217_v25 = vadd.s32 32, %v3473_v15  ;;  %v3703_v62 = vld [vmem:[%s3497_s4 + $0x70] sm:$0xff] }
  0x1d   : > { %3214 = vmatpush3.bf16.msra.mxu1 %v3324_v13  ;;  %v928_v12 = vsel %vm5018_vm1, %v875_v0, %v876_v4  ;;  %vm3636_vm11 = vcmp.ne.s32.totalorder %v263_v8, 0  ;;  %v681_v30 = vrot.slane %v3548_v45, 7  ;;  %v222_v34 = vadd.s32 72, %v3473_v15 }
  0x1e   : > { %3215 = vmatprep.subr.bf16.mxu1 %v3327_v16  ;;  %v880_v36 = vrot.slane %v3634_v22, 1  ;;  %vm3666_vm12 = vmpackc.low %vm3400_vm4, %vm3636_vm11  ;;  %v5090_v40 = vmov 0  ;;  %v1070_v41 = vpack.c.bf16 %v3576_v60, %v3548_v45  ;;  %v224_v43 = vadd.s32 88, %v3473_v15 }
  0x1f   : > { %2944 = vmatpush3.bf16.msra.mxu0 %v3325_v14  ;;  %v738_v14 = vsel %vm5017_vm0, %v679_v59, %v680_v63  ;;  %v5091_v40 = vsel %vm3666_vm12, 4294967295, %v5090_v40  ;;  %v277_v44 = vand.u32 15, %v217_v25  ;;  %v737_v50 = vsel %vm5017_vm0, %v680_v63, %v681_v30 }
  0x20   : > { %2945 = vmatprep.subr.bf16.mxu0 %v3326_v17  ;;  %v877_v17 = vrot.slane %v3598_v5, 1  ;;  %v2575_v29 = vpack.c.bf16 %v738_v14, %v739_v11  ;;  %v882_v53 = vrot.slane %v3658_v37, 1  ;;  %v219_v59 = vadd.s32 48, %v3473_v15  ;;  %v3730_v11 = vld [vmem:[%s3497_s4 + $0x80] sm:$0xff] }
  0x21   : > { %3216 = vmatpush3.bf16.msra.mxu1 %v3327_v16  ;;  %v2643_v16 = vpack.c.bf16 %v928_v12, %v929_v9  ;;  %vm2905_vm3 = vcmp.ne.s32.totalorder %v277_v44, 0  ;;  %v883_v61 = vrot.slane %v3698_v58, 1  ;;  %v1073_v0 = vpack.c.bf16 %v3598_v5, %v3566_v54  ;;  %v3719_v9 = vld [vmem:[%s3497_s4 + $0x78] sm:$0xff] }
  0x22   : > { %3217 = vmatprep.subr.bf16.mxu1 %v3330_v20  ;;  %v927_v33 = vsel %vm5018_vm1, %v876_v4, %v877_v17  ;;  %v683_v2 = vrot.slane %v3566_v54, 7  ;;  %v226_v8 = vadd.s32 104, %v3473_v15  ;;  %vm3722_vm7 = vmpackc.low %vm3400_vm4, %vm2905_vm3  ;;  %v884_v54 = vrot.slane %v3703_v62, 1 }
  0x23   : > { %2946 = vmatpush3.bf16.msra.mxu0 %v3328_v18  ;;  %v878_v18 = vrot.slane %v3601_v6, 1  ;;  %v228_v12 = vadd.s32 120, %v3473_v15  ;;  %v291_v14 = vand.u32 15, %v219_v59 }
  0x24   : > { %2947 = vmatprep.subr.bf16.mxu0 %v3329_v21  ;;  %v3631_v21 = vld [vmem:[%s3497_s4 + $0x48] sm:$0xff] }
  0x25   : > { %3218 = vmatpush3.bf16.msra.mxu1 %v3330_v20  ;;  %v298_v20 = vand.u32 15, %v220_v7  ;;  %v879_v27 = vrot.slane %v3631_v21, 1  ;;  %v926_v32 = vsel %vm5018_vm1, %v877_v17, %v878_v18  ;;  %vm2906_vm3 = vcmp.ne.s32.totalorder %v291_v14, 0 }
  0x26   : > { %3219 = vmatprep.subr.bf16.mxu1 %v3333_v24  ;;  %v2647_v49 = vpack.c.bf16 %v926_v32, %v927_v33  ;;  %v686_v33 = vrot.slane %v3631_v21, 7 }
  0x27   : > { %2948 = vmatpush3.bf16.msra.mxu0 %v3331_v23  ;;  %vm2922_vm13 = vcmp.ne.s32.totalorder %v298_v20, 15  ;;  %v925_v42 = vsel %vm5018_vm1, %v878_v18, %v879_v27  ;;  %v920_v18 = vsel %vm5018_vm1, %v883_v61, %v884_v54  ;;  %v885_v20 = vrot.slane %v3719_v9, 1  ;;  %v3737_v23 = vld [vmem:[%s3497_s4 + $0x88] sm:$0xff] }
  0x28   : > { %2949 = vmatprep.subr.bf16.mxu0 %v3332_v31  ;;  %v3647_v31 = vld [vmem:[%s3497_s4 + $0x58] sm:$0xff]  ;;  %vm3687_vm14 = vmpackc.low %vm2922_vm13, %vm3400_vm4 }
  0x29   : > { %3220 = vmatpush3.bf16.msra.mxu1 %v3333_v24  ;;  %v682_v24 = vrot.slane %v3576_v60, 7  ;;  %v881_v45 = vrot.slane %v3647_v31, 1  ;;  %v685_v60 = vrot.slane %v3601_v6, 7  ;;  %v919_v44 = vsel %vm5018_vm1, %v884_v54, %v885_v20 }
  0x2a   : > { %3221 = vmatprep.subr.bf16.mxu1 %v3335_v47  ;;  %v223_v54 = vadd.s32 80, %v3473_v15 }
  0x2b   : > { %2950 = vmatpush3.bf16.msra.mxu0 %v3334_v46  ;;  %v312_v46 = vand.u32 15, %v222_v34  ;;  %v736_v48 = vsel %vm5017_vm0, %v681_v30, %v682_v24  ;;  %v922_v4 = vsel %vm5018_vm1, %v881_v45, %v882_v53  ;;  %v923_v7 = vsel %vm5018_vm1, %v880_v36, %v881_v45 }
  0x2c   : > { %3255 = vmatprep.subr.bf16.mxu0 %v3336_v39  ;;  %v2579_v63 = vpack.c.bf16 %v736_v48, %v737_v50  ;;  %v2655_v17 = vpack.c.bf16 %v922_v4, %v923_v7  ;;  %v735_v32 = vsel %vm5017_vm0, %v682_v24, %v683_v2  ;;  %v3778_v48 = vld [vmem:[%s3497_s4 + $0xa0] sm:$0xff]  ;;  %v1076_v45 = vpack.c.bf16 %v3631_v21, %v3601_v6 }
  0x2d   : > { %3222 = vmatpush3.bf16.msra.mxu1 %v3335_v47  ;;  %v924_v47 = vsel %vm5018_vm1, %v879_v27, %v880_v36  ;;  %vm2923_vm15 = vcmp.ne.s32.totalorder %v312_v46, 15  ;;  %v354_v36 = vand.u32 15, %v228_v12  ;;  %v230_v46 = vadd.s32 136, %v3473_v15  ;;  %v3815_v12 = vld [vmem:[%s3497_s4 + $0xa8] sm:$0xff] }
  0x2e   : > { %2572 = vmatmul.mubr.msk.bf16.vlgmr.msra.gmra.mrb[0].mxu0 %vm3587_vm6, %v2571_v56  ;;  %v2651_v52 = vpack.c.bf16 %v924_v47, %v925_v42  ;;  %vm3693_vm2 = vmpackc.low %vm2923_vm15, %vm3400_vm4  ;;  %v326_v56 = vand.u32 15, %v224_v43  ;;  %v887_v42 = vrot.slane %v3737_v23, 1  ;;  %v3775_v47 = vld [vmem:[%s3497_s4 + $0x98] sm:$0xff]  ;;  %v690_v21 = vrot.slane %v3698_v58, 7 }
  0x2f   : > { %1302 = vmatprep.mubr.bf16.mxu0 %v1067_v3  ;;  %3256 = vmatpush3.bf16.msra.mxu0 %v3336_v39  ;;  %v684_v3 = vrot.slane %v3598_v5, 7  ;;  %v921_v5 = vsel %vm5018_vm1, %v882_v53, %v883_v61  ;;  %v3760_v39 = vld [vmem:[%s3497_s4 + $0x90] sm:$0xff]  ;;  %v368_v59 = vand.u32 15, %v230_v46  ;;  %v889_v7 = vrot.slane %v3775_v47, 1 }
  0x30   : > { %3224 = vmatmul.mubr.msk.bf16.vlgmr.msra.gmra.mrb[0].mxu1 %vm3617_vm9, %v2639_v10  ;;  %v5096_v10 = vmov 0  ;;  %vm2924_vm8 = vcmp.ne.s32.totalorder %v326_v56, 15  ;;  %v2659_v27 = vpack.c.bf16 %v920_v18, %v921_v5  ;;  %v888_v50 = vrot.slane %v3760_v39, 1 }
  0x31   : > { %3227 = vmatprep.mubr.msk.bf16.mxu1 %vm3626_vm10, %v2643_v16  ;;  %v5097_v10 = vsel %vm3722_vm7, 4294967295, %v5096_v10  ;;  %v340_v16 = vand.u32 15, %v226_v8  ;;  %vm3742_vm11 = vmpackc.low %vm2924_vm8, %vm3400_vm4  ;;  %v734_v30 = vsel %vm5017_vm0, %v683_v2, %v684_v3  ;;  %v732_v56 = vsel %vm5017_vm0, %v685_v60, %v686_v33 }
  0x32   : > { %v2583_v24 = vpack.c.bf16 %v734_v30, %v735_v32  ;;  %vm3781_vm8 = vmpackc.low %vm3400_vm4, %vm2906_vm3  ;;  %v733_v61 = vsel %vm5017_vm0, %v684_v3, %v685_v60  ;;  %v916_v6 = vsel %vm5018_vm1, %v887_v42, %v888_v50  ;;  %v890_v3 = vrot.slane %v3778_v48, 1 }
  0x33   : > { %vm2925_vm13 = vcmp.ne.s32.totalorder %v340_v16, 15  ;;  %v5107_v5 = vmov 0  ;;  %v2587_v14 = vpack.c.bf16 %v732_v56, %v733_v61  ;;  %v891_v16 = vrot.slane %v3815_v12, 1 }
  0x34   : > { %vm3755_vm15 = vmpackc.low %vm2925_vm13, %vm3400_vm4  ;;  %vm2926_vm13 = vcmp.ne.s32.totalorder %v354_v36, 15  ;;  %v687_v18 = vrot.slane %v3634_v22, 7  ;;  %v5111_v30 = vmov 0  ;;  %v1079_v32 = vpack.c.bf16 %v3647_v31, %v3634_v22 }
  0x35   : > { %vm3802_vm3 = vmpackc.low %vm2926_vm13, %vm3400_vm4  ;;  %v234_v36 = vadd.s32 168, %v3473_v15  ;;  %v319_v60 = vand.u32 15, %v223_v54 }
  0x36   : > { %2576 = vmatmul.mubr.msk.bf16.gmra.mrb[4].mxu0 %vm3666_vm12, %v2575_v29  ;;  %v886_v29 = vrot.slane %v3730_v11, 1 }
  0x37   : > { %1310 = vmatprep.mubr.bf16.mxu0 %v1070_v41  ;;  %v221_v41 = vadd.s32 64, %v3473_v15 }
  0x38   : > { %3228 = vmatmul.mubr.msk.bf16.gmra.mrb[4].mxu1 %vm3687_vm14, %v2647_v49  ;;  %v918_v43 = vsel %vm5018_vm1, %v885_v20, %v886_v29  ;;  %v5102_v49 = vmov 0  ;;  %v688_v20 = vrot.slane %v3647_v31, 7  ;;  %v5115_v31 = vmov 0 }
  0x39   : > { %3231 = vmatprep.mubr.msk.bf16.mxu1 %vm3693_vm2, %v2651_v52  ;;  %v5103_v49 = vsel %vm3781_vm8, 4294967295, %v5102_v49  ;;  %v917_v52 = vsel %vm5018_vm1, %v886_v29, %v887_v42  ;;  %v305_v53 = vand.u32 15, %v221_v41  ;;  %v3840_v41 = vld [vmem:[%s3497_s4 + $0xb8] sm:$0xff] }
  0x3a   : > { %5104 = vst [vmem:[#allocation2_spill] sm:$0xff] %v5103_v49  ;;  %v2667_v4 = vpack.c.bf16 %v916_v6, %v917_v52  ;;  %v5118_v6 = vmov 0 }
  0x3b   : > { %vm2907_vm0 = vcmp.ne.s32.totalorder %v305_v53, 0  ;;  %v893_v53 = vrot.slane %v3840_v41, 1 }
  0x3e   : > { %2580 = vmatmul.mubr.msk.bf16.gmra.mrb[8].mxu0 %vm3722_vm7, %v2579_v63  ;;  %v2663_v63 = vpack.c.bf16 %v918_v43, %v919_v44  ;;  %vm2927_vm7 = vcmp.ne.s32.totalorder %v368_v59, 15  ;;  %v3846_v43 = vld [vmem:[%s3497_s4 + $0xc0] sm:$0xff]  ;;  %v236_v44 = vadd.s32 184, %v3473_v15 }
  0x3f   : > { %1318 = vmatprep.mubr.bf16.mxu0 %v1073_v0  ;;  %v232_v0 = vadd.s32 152, %v3473_v15  ;;  %vm3810_vm1 = vmpackc.low %vm2927_vm7, %vm3400_vm4  ;;  %vm5109_vm7 = vcmp.lt.s32.totalorder %v3473_v15, 7  ;;  %v894_v61 = vrot.slane %v3846_v43, 1 }
  0x40   : > { %3232 = vmatmul.mubr.msk.bf16.gmra.mrb[8].mxu1 %vm3742_vm11, %v2655_v17  ;;  %v5108_v5 = vsel %vm3810_vm1, 4294967295, %v5107_v5  ;;  %v3821_v17 = vld [vmem:[%s3497_s4 + $0xb0] sm:$0xff]  ;;  %vm5110_vm13 = vmmov %vm5109_vm7  ;;  %v410_v52 = vand.u32 15, %v236_v44 }
  0x41   : > { %3235 = vmatprep.mubr.msk.bf16.mxu1 %vm3755_vm15, %v2659_v27  ;;  %v382_v8 = vand.u32 15, %v232_v0  ;;  %v914_v27 = vsel %vm5109_vm7, %v889_v7, %v890_v3  ;;  %v915_v29 = vsel %vm5110_vm13, %v888_v50, %v889_v7  ;;  %v892_v42 = vrot.slane %v3821_v17, 1  ;;  %v3873_v0 = vld [vmem:[%s3497_s4 + $0xc8] sm:$0xff] }
  0x42   : > { %v2671_v46 = vpack.c.bf16 %v914_v27, %v915_v29  ;;  %v3898_v27 = vld [vmem:[%s3497_s4 + $0xd8] sm:$0xff] }
  0x43   : > { %vm2928_vm12 = vcmp.ne.s32.totalorder %v382_v8, 15  ;;  %v912_v50 = vsel %vm5109_vm7, %v891_v16, %v892_v42 }
  0x44   : > { %vm3854_vm13 = vmpackc.low %vm2928_vm12, %vm3400_vm4  ;;  %vm2908_vm12 = vcmp.ne.s32.totalorder %v319_v60, 0  ;;  %v3904_v60 = vld [vmem:[%s3497_s4 + $0xe0] sm:$0xff] }
  0x45   : > { %v5116_v31 = vsel %vm3854_vm13, 4294967295, %v5115_v31 }
  0x46   : > { %2584 = vmatmul.mubr.msk.bf16.gmra.mrb[12].mxu0 %vm3781_vm8, %v2583_v24  ;;  %vm3832_vm8 = vmpackc.low %vm3400_vm4, %vm2907_vm0  ;;  %v913_v24 = vsel %vm5109_vm7, %v890_v3, %v891_v16  ;;  %vm5114_vm0 = vcmp.lt.s32.totalorder %v3473_v15, 1  ;;  %v689_v3 = vrot.slane %v3658_v37, 7  ;;  %v1082_v16 = vpack.c.bf16 %v3698_v58, %v3658_v37 }
  0x47   : > { %1326 = vmatprep.mubr.bf16.mxu0 %v1076_v45  ;;  %v5112_v30 = vsel %vm3832_vm8, 4294967295, %v5111_v30  ;;  %v396_v45 = vand.u32 15, %v234_v36  ;;  %v730_v22 = vsel %vm5114_vm0, %v687_v18, %v688_v20  ;;  %v2675_v59 = vpack.c.bf16 %v912_v50, %v913_v24 }
  0x48   : > { %3236 = vmatmul.mubr.msk.bf16.gmra.mrb[12].mxu1 %vm3802_vm3, %v2663_v63  ;;  %5113 = vst [vmem:[#allocation3_spill] sm:$0xff] %v5112_v30  ;;  %v225_v63 = vadd.s32 96, %v3473_v15  ;;  %v5126_v58 = vmov 0 }
  0x49   : > { %3239 = vmatprep.mubr.msk.bf16.mxu1 %vm3810_vm1, %v2667_v4  ;;  %vm2929_vm6 = vcmp.ne.s32.totalorder %v396_v45, 15  ;;  %v3880_v4 = vld [vmem:[%s3497_s4 + $0xd0] sm:$0xff]  ;;  %v897_v45 = vrot.slane %v3898_v27, 1 }
  0x4a   : > { %v333_v29 = vand.u32 15, %v225_v63 }
  0x4e   : > { %2588 = vmatmul.mubr.msk.bf16.gmra.mrb[16].mxu0 %vm3832_vm8, %v2587_v14  ;;  %vm5117_vm8 = vmmov %vm5114_vm0  ;;  %v5122_v14 = vmov 0 }
  0x4f   : > { %1334 = vmatprep.mubr.bf16.mxu0 %v1079_v32  ;;  %v731_v56 = vsel %vm5117_vm8, %v686_v33, %v687_v18  ;;  %vm3868_vm0 = vmpackc.low %vm2929_vm6, %vm3400_vm4  ;;  %v895_v33 = vrot.slane %v3873_v0, 1  ;;  %v238_v18 = vadd.s32 200, %v3473_v15  ;;  %v896_v32 = vrot.slane %v3880_v4, 1 }
  0x50   : > { %v5119_v6 = vsel %vm3868_vm0, 4294967295, %v5118_v6  ;;  %3240 = vmatmul.mubr.msk.bf16.gmra.mrb[16].mxu1 %vm3854_vm13, %v2671_v46  ;;  %v2591_v7 = vpack.c.bf16 %v730_v22, %v731_v56  ;;  %vm5120_vm6 = vmmov %vm5109_vm7  ;;  %vm2930_vm13 = vcmp.ne.s32.totalorder %v410_v52, 15  ;;  %v240_v46 = vadd.s32 216, %v3473_v15 }
  0x51   : > { %3243 = vmatprep.mubr.msk.bf16.mxu1 %vm3868_vm0, %v2675_v59  ;;  %v910_v8 = vsel %vm5120_vm6, %v893_v53, %v894_v61  ;;  %vm5121_vm8 = vmmov %vm5120_vm6  ;;  %v909_v36 = vsel %vm5120_vm6, %v894_v61, %v895_v33  ;;  %v424_v24 = vand.u32 15, %v238_v18  ;;  %v898_v52 = vrot.slane %v3904_v60, 1  ;;  %v3931_v61 = vld [vmem:[%s3497_s4 + $0xe8] sm:$0xff] }
  0x52   : > { %v911_v54 = vsel %vm5121_vm8, %v892_v42, %v893_v53  ;;  %vm3890_vm7 = vmpackc.low %vm3400_vm4, %vm2908_vm12  ;;  %vm5125_vm12 = vcmp.lt.s32.totalorder %v3473_v15, 1  ;;  %v227_v53 = vadd.s32 112, %v3473_v15  ;;  %v438_v56 = vand.u32 15, %v240_v46 }
  0x53   : > { %v5123_v14 = vsel %vm3890_vm7, 4294967295, %v5122_v14  ;;  %v2679_v42 = vpack.c.bf16 %v910_v8, %v911_v54  ;;  %v728_v37 = vsel %vm5125_vm12, %v689_v3, %v690_v21  ;;  %vm3911_vm8 = vmpackc.low %vm2930_vm13, %vm3400_vm4  ;;  %vm2909_vm13 = vcmp.ne.s32.totalorder %v333_v29, 0 }
  0x54   : > { %5124 = vst [vmem:[#allocation4_spill] sm:$0xff] %v5123_v14  ;;  %v5127_v58 = vsel %vm3911_vm8, 4294967295, %v5126_v58  ;;  %vm5128_vm0 = vmmov %vm5120_vm6  ;;  %v5130_v59 = vmov 0  ;;  %v5134_v8 = vmov 0  ;;  %v1085_v54 = vpack.c.bf16 %v3719_v9, %v3703_v62 }
  0x55   : > { %v908_v44 = vsel %vm5128_vm0, %v895_v33, %v896_v32  ;;  %vm5129_vm6 = vmmov %vm5125_vm12  ;;  %vm5132_vm12 = vcmp.lt.s32.totalorder %v3473_v15, 7  ;;  %v692_v18 = vrot.slane %v3719_v9, 7  ;;  %v347_v29 = vand.u32 15, %v227_v53 }
  0x56   : > { %2592 = vmatmul.mubr.msk.bf16.gmra.mrb[20].mxu0 %vm3890_vm7, %v2591_v7  ;;  %v729_v22 = vsel %vm5129_vm6, %v688_v20, %v689_v3  ;;  %vm2931_vm7 = vcmp.ne.s32.totalorder %v424_v24, 15  ;;  %v2683_v50 = vpack.c.bf16 %v908_v44, %v909_v36  ;;  %v906_v20 = vsel %vm5132_vm12, %v897_v45, %v898_v52  ;;  %vm5133_vm6 = vmmov %vm5132_vm12  ;;  %v3941_v3 = vld [vmem:[%s3497_s4 + $0xf0] sm:$0xff] }
  0x57   : > { %1342 = vmatprep.mubr.bf16.mxu0 %v1082_v16  ;;  %vm3926_vm0 = vmpackc.low %vm2931_vm7, %vm3400_vm4  ;;  %v2595_v63 = vpack.c.bf16 %v728_v37, %v729_v22  ;;  %v907_v33 = vsel %vm5133_vm6, %v896_v32, %v897_v45  ;;  %v899_v7 = vrot.slane %v3931_v61, 1  ;;  %v691_v16 = vrot.slane %v3703_v62, 7 }
  0x58   : > { %3244 = vmatmul.mubr.msk.bf16.gmra.mrb[20].mxu1 %vm3911_vm8, %v2679_v42  ;;  %v5131_v59 = vsel %vm3926_vm0, 4294967295, %v5130_v59  ;;  %vm3944_vm7 = vmpackc.low %vm3400_vm4, %vm2909_vm13  ;;  %vm2932_vm12 = vcmp.ne.s32.totalorder %v438_v56, 15  ;;  %v242_v32 = vadd.s32 232, %v3473_v15  ;;  %v2687_v36 = vpack.c.bf16 %v906_v20, %v907_v33 }
  0x59   : > { %3247 = vmatprep.mubr.msk.bf16.mxu1 %vm3926_vm0, %v2683_v50  ;;  %v5135_v8 = vsel %vm3944_vm7, 4294967295, %v5134_v8  ;;  %v900_v42 = vrot.slane %v3941_v3, 1  ;;  %v905_v24 = vsel %vm5133_vm6, %v898_v52, %v899_v7  ;;  %v244_v37 = vadd.s32 248, %v3473_v15  ;;  %vm3960_vm13 = vmpackc.low %vm2932_vm12, %vm3400_vm4 }
  0x5a   : > { %5136 = vst [vmem:[#allocation5_spill] sm:$0xff] %v5135_v8  ;;  %v452_v9 = vand.u32 15, %v242_v32  ;;  %v901_v44 = vrot.slane %v3514_v28, 1  ;;  %vm5139_vm0 = vcmp.lt.s32.totalorder %v3473_v15, 1  ;;  %v229_v52 = vadd.s32 128, %v3473_v15 }
  0x5b   : > { %v726_v46 = vsel %vm5139_vm0, %v691_v16, %v692_v18  ;;  %vm5140_vm8 = vmmov %vm5139_vm0  ;;  %v904_v22 = vsel %vm5133_vm6, %v899_v7, %v900_v42  ;;  %v466_v50 = vand.u32 15, %v244_v37  ;;  %v5141_v56 = vmov 0 }
  0x5c   : > { %v727_v45 = vsel %vm5140_vm8, %v690_v21, %v691_v16  ;;  %vm2933_vm12 = vcmp.ne.s32.totalorder %v452_v9, 15  ;;  %v2691_v53 = vpack.c.bf16 %v904_v22, %v905_v24  ;;  %vm5143_vm8 = vmmov %vm5133_vm6  ;;  %v5145_v33 = vmov 0 }
  0x5d   : > { %vm3975_vm1 = vmpackc.low %vm2933_vm12, %vm3400_vm4  ;;  %v903_v21 = vsel %vm5143_vm8, %v900_v42, %v901_v44  ;;  %v694_v7 = vrot.slane %v3737_v23, 7  ;;  %v693_v16 = vrot.slane %v3730_v11, 7  ;;  %vm2934_vm12 = vcmp.ne.s32.totalorder %v466_v50, 15 }
  0x5e   : > { %2596 = vmatmul.mubr.msk.bf16.gmra.mrb[24].mxu0 %vm3944_vm7, %v2595_v63  ;;  %vm2910_vm7 = vcmp.ne.s32.totalorder %v347_v29, 0  ;;  %v5142_v56 = vsel %vm3975_vm1, 4294967295, %v5141_v56  ;;  %v2599_v63 = vpack.c.bf16 %v726_v46, %v727_v45  ;;  %vm5144_vm0 = vmmov %vm5133_vm6  ;;  %v361_v29 = vand.u32 15, %v229_v52 }
  0x5f   : > { %1350 = vmatprep.mubr.bf16.mxu0 %v1085_v54  ;;  %v934_v20 = vsel %vm5144_vm0, %v901_v44, %v870_v38  ;;  %vm3988_vm6 = vmpackc.low %vm3400_vm4, %vm2910_vm7  ;;  %v1088_v54 = vpack.c.bf16 %v3737_v23, %v3730_v11  ;;  %vm5150_vm7 = vcmp.lt.s32.totalorder %v3473_v15, 1  ;;  %v231_v11 = vadd.s32 144, %v3473_v15 }
  0x60   : > { %3248 = vmatmul.mubr.msk.bf16.gmra.mrb[24].mxu1 %vm3960_vm13, %v2687_v36  ;;  %v5146_v33 = vsel %vm3988_vm6, 4294967295, %v5145_v33  ;;  %v2695_v32 = vpack.c.bf16 %v934_v20, %v903_v21  ;;  %vm3999_vm8 = vmpackc.low %vm2934_vm12, %vm3400_vm4  ;;  %v724_v38 = vsel %vm5150_vm7, %v693_v16, %v694_v7  ;;  %v5152_v42 = vmov 0 }
  0x61   : > { %3251 = vmatprep.mubr.msk.bf16.mxu1 %vm3975_vm1, %v2691_v53  ;;  %5147 = vst [vmem:[#allocation6_spill] sm:$0xff] %v5146_v33  ;;  %vm5151_vm0 = vmmov %vm5150_vm7  ;;  %vm2911_vm1 = vcmp.ne.s32.totalorder %v361_v29, 0  ;;  %v1091_v24 = vpack.c.bf16 %v3775_v47, %v3760_v39  ;;  %v695_v37 = vrot.slane %v3760_v39, 7  ;;  %v696_v9 = vrot.slane %v3775_v47, 7 }
  0x62   : > { %v725_v23 = vsel %vm5151_vm0, %v692_v18, %v693_v16  ;;  %v375_v18 = vand.u32 15, %v231_v11  ;;  %vm5155_vm12 = vmmov %vm5151_vm0  ;;  %v233_v45 = vadd.s32 160, %v3473_v15  ;;  %v5157_v39 = vmov 0 }
  0x63   : > { %v2603_v36 = vpack.c.bf16 %v724_v38, %v725_v23  ;;  %v722_v44 = vsel %vm5155_vm12, %v695_v37, %v696_v9  ;;  %v698_v47 = vrot.slane %v3815_v12, 7  ;;  %v1094_v50 = vpack.c.bf16 %v3815_v12, %v3778_v48 }
  0x64   : > { %vm2912_vm7 = vcmp.ne.s32.totalorder %v375_v18, 0  ;;  %v697_v52 = vrot.slane %v3778_v48, 7  ;;  %v389_v53 = vand.u32 15, %v233_v45  ;;  %v235_v20 = vadd.s32 176, %v3473_v15  ;;  %v3338_v18 = vld [vmem:[%s5013_s1 + $0x150] sm:$0xff]   ;;  %v3339_v45 = vld [vmem:[%s5013_s1 + $0x158] sm:$0xff]  }
  0x65   : > { %v5161_v12 = vmov 0  ;;  %v1097_v48 = vpack.c.bf16 %v3840_v41, %v3821_v17  ;;  %v700_v16 = vrot.slane %v3840_v41, 7  ;;  %v237_v23 = vadd.s32 192, %v3473_v15 }
  0x66   : > { %2600 = vmatmul.mubr.msk.bf16.gmra.mrb[28].mxu0 %vm3988_vm6, %v2599_v63  ;;  %vm4011_vm6 = vmpackc.low %vm3400_vm4, %vm2911_vm1  ;;  %v403_v29 = vand.u32 15, %v235_v20  ;;  %v5165_v41 = vmov 0  ;;  %v3340_v20 = vld [vmem:[%s5013_s1 + $0x160] sm:$0xff]  }
  0x67   : > { %1358 = vmatprep.mubr.bf16.mxu0 %v1088_v54  ;;  %v5153_v42 = vsel %vm4011_vm6, 4294967295, %v5152_v42  ;;  %vm5156_vm1 = vmmov %vm5151_vm0  ;;  %v699_v54 = vrot.slane %v3821_v17, 7  ;;  %v3337_v17 = vld [vmem:[%s5013_s1 + $0x148] sm:$0xff]  }
  0x68   : > { %3252 = vmatmul.mubr.msk.bf16.gmra.mrb[28].mxu1 %vm3999_vm8, %v2695_v32  ;;  %5154 = vst [vmem:[#allocation7_spill] sm:$0xff] %v5153_v42  ;;  %v723_v46 = vsel %vm5156_vm1, %v694_v7, %v695_v37  ;;  %vm4027_vm0 = vmpackc.low %vm3400_vm4, %vm2912_vm7  ;;  %v721_v21 = vsel %vm5156_vm1, %v696_v9, %v697_v52  ;;  %vm2913_vm7 = vcmp.ne.s32.totalorder %v389_v53, 0  ;;  %v701_v37 = vrot.slane %v3846_v43, 7  ;;  %3257 = vmatprep.subr.bf16.mxu0 %v3337_v17 }
  0x69   : > { %v2607_v22 = vpack.c.bf16 %v722_v44, %v723_v46  ;;  %v5158_v39 = vsel %vm4027_vm0, 4294967295, %v5157_v39  ;;  %vm5160_vm12 = vmmov %vm5156_vm1  ;;  %v719_v38 = vsel %vm5156_vm1, %v698_v47, %v699_v54  ;;  %v417_v9 = vand.u32 15, %v237_v23  ;;  %3258 = vmatpush3.bf16.msra.mxu0 %v3337_v17 }
  0x6a   : > { %5159 = vst [vmem:[#allocation8_spill] sm:$0xff] %v5158_v39  ;;  %v720_v63 = vsel %vm5160_vm12, %v697_v52, %v698_v47  ;;  %vm5164_vm12 = vmmov %vm5156_vm1  ;;  %v717_v46 = vsel %vm5156_vm1, %v700_v16, %v701_v37  ;;  %3259 = vmatprep.subr.bf16.mxu0 %v3338_v18  ;;  %v1103_v47 = vpack.c.bf16 %v3898_v27, %v3880_v4  ;;  %v704_v52 = vrot.slane %v3898_v27, 7 }
  0x6b   : > { %v2611_v7 = vpack.c.bf16 %v720_v63, %v721_v21  ;;  %v718_v32 = vsel %vm5164_vm12, %v699_v54, %v700_v16  ;;  %vm5168_vm12 = vmmov %vm5156_vm1  ;;  %v1106_v54 = vpack.c.bf16 %v3931_v61, %v3904_v60  ;;  %v705_v16 = vrot.slane %v3904_v60, 7  ;;  %v3342_v60 = vld [vmem:[%s5013_s1 + $0x170] sm:$0xff]  }
  0x6c   : > { %v2615_v11 = vpack.c.bf16 %v718_v32, %v719_v38  ;;  %v5177_v17 = vmov 0 }
  0x6d   : > { %3260 = vmatpush3.bf16.msra.mxu0 %v3338_v18  ;;  %v713_v23 = vsel %vm5156_vm1, %v704_v52, %v705_v16 }
  0x6e   : > { %2604 = vmatmul.mubr.msk.bf16.gmra.mrb[32].mxu0 %vm4011_vm6, %v2603_v36  ;;  %vm4043_vm6 = vmpackc.low %vm3400_vm4, %vm2913_vm7  ;;  %vm2914_vm7 = vcmp.ne.s32.totalorder %v403_v29, 0  ;;  %v702_v36 = vrot.slane %v3873_v0, 7  ;;  %3261 = vmatprep.subr.bf16.mxu0 %v3339_v45  ;;  %v3341_v29 = vld [vmem:[%s5013_s1 + $0x168] sm:$0xff]  }
  0x6f   : > { %1366 = vmatprep.mubr.bf16.mxu0 %v1091_v24  ;;  %v5162_v12 = vsel %vm4043_vm6, 4294967295, %v5161_v12  ;;  %v1100_v24 = vpack.c.bf16 %v3873_v0, %v3846_v43  ;;  %v239_v43 = vadd.s32 208, %v3473_v15 }
  0x70   : > { %5163 = vst [vmem:[#allocation9_spill] sm:$0xff] %v5162_v12  ;;  %v716_v44 = vsel %vm5168_vm12, %v701_v37, %v702_v36  ;;  %vm5172_vm12 = vmmov %vm5156_vm1  ;;  %v3343_v37 = vld [vmem:[%s5013_s1 + $0x178] sm:$0xff]  }
  0x71   : > { %v2619_v0 = vpack.c.bf16 %v716_v44, %v717_v46  ;;  %v431_v53 = vand.u32 15, %v239_v43  ;;  %3262 = vmatpush3.bf16.msra.mxu0 %v3339_v45  ;;  %v5181_v46 = vmov 0  ;;  %v3346_v43 = vld [vmem:[%s5013_s1 + $0x108] sm:$0xff]   ;;  %v3348_v45 = vld [vmem:[%s5013_s1 + $0x110] sm:$0xff]  }
  0x72   : > { %3263 = vmatprep.subr.bf16.mxu0 %v3340_v20 }
  0x75   : > { %3264 = vmatpush3.bf16.msra.mxu0 %v3340_v20  ;;  %v3355_v20 = vld [vmem:[%s5013_s1 + $0xe8] sm:$0xff]  }
  0x76   : > { %2608 = vmatmul.mubr.msk.bf16.gmra.mrb[36].mxu0 %vm4027_vm0, %v2607_v22  ;;  %vm4062_vm0 = vmpackc.low %vm3400_vm4, %vm2914_vm7  ;;  %vm2915_vm7 = vcmp.ne.s32.totalorder %v417_v9, 0  ;;  %v5169_v22 = vmov 0  ;;  %3265 = vmatprep.subr.bf16.mxu0 %v3341_v29 }
  0x77   : > { %1374 = vmatprep.mubr.bf16.mxu0 %v1094_v50  ;;  %v5166_v41 = vsel %vm4062_vm0, 4294967295, %v5165_v41  ;;  %v703_v50 = vrot.slane %v3880_v4, 7  ;;  %v241_v4 = vadd.s32 224, %v3473_v15 }
  0x78   : > { %5167 = vst [vmem:[#allocation10_spill] sm:$0xff] %v5166_v41 }
  0x79   : > { %v714_v63 = vsel %vm5172_vm12, %v703_v50, %v704_v52  ;;  %v715_v21 = vsel %vm5156_vm1, %v702_v36, %v703_v50  ;;  %v445_v32 = vand.u32 15, %v241_v4  ;;  %vm5176_vm12 = vmmov %vm5156_vm1  ;;  %3266 = vmatpush3.bf16.msra.mxu0 %v3341_v29  ;;  %v1109_v36 = vpack.c.bf16 %v3514_v28, %v3941_v3  ;;  %v3344_v28 = vld [vmem:[%s5013_s1 + $0x100] sm:$0xff]   ;;  %v3350_v50 = vld [vmem:[%s5013_s1 + $0x118] sm:$0xff]  }
  0x7a   : > { %v2623_v27 = vpack.c.bf16 %v714_v63, %v715_v21  ;;  %3267 = vmatprep.subr.bf16.mxu0 %v3342_v60  ;;  %3071 = vmatprep.subr.bf16.mxu1 %v3344_v28  ;;  %v3351_v52 = vld [vmem:[%s5013_s1 + $0xd8] sm:$0xff]   ;;  %v3353_v63 = vld [vmem:[%s5013_s1 + $0xe0] sm:$0xff]   ;;  %v3354_v21 = vld [vmem:[%s5013_s1 + $0x128] sm:$0xff]  }
  0x7b   : > { %v3356_v4 = vld [vmem:[%s5013_s1 + $0x130] sm:$0xff]  }
  0x7d   : > { %3268 = vmatpush3.bf16.msra.mxu0 %v3342_v60 }
  0x7e   : > { %2612 = vmatmul.mubr.msk.bf16.gmra.mrb[40].mxu0 %vm4043_vm6, %v2611_v7  ;;  %v5173_v7 = vmov 0  ;;  %3269 = vmatprep.subr.bf16.mxu0 %v3343_v37 }
  0x7f   : > { %1382 = vmatprep.mubr.bf16.mxu0 %v1097_v48  ;;  %v706_v48 = vrot.slane %v3931_v61, 7  ;;  %v243_v61 = vadd.s32 240, %v3473_v15 }
  0x81   : > { %v712_v38 = vsel %vm5176_vm12, %v705_v16, %v706_v48  ;;  %v459_v9 = vand.u32 15, %v243_v61  ;;  %vm5180_vm12 = vmmov %vm5156_vm1  ;;  %3270 = vmatpush3.bf16.msra.mxu0 %v3343_v37  ;;  %v3357_v16 = vld [vmem:[%s5013_s1 + $0xf0] sm:$0xff]   ;;  %v3359_v37 = vld [vmem:[%s5013_s1 + $0xf8] sm:$0xff]  }
  0x86   : > { %2616 = vmatmul.mubr.msk.bf16.gmra.mrb[44].mxu0 %vm4062_vm0, %v2615_v11  ;;  %vm4084_vm0 = vmpackc.low %vm3400_vm4, %vm2915_vm7  ;;  %vm2916_vm7 = vcmp.ne.s32.totalorder %v431_v53, 0  ;;  %v2627_v11 = vpack.c.bf16 %v712_v38, %v713_v23  ;;  %v3352_v53 = vld [vmem:[%s5013_s1 + $0x120] sm:$0xff]  }
  0x87   : > { %1390 = vmatprep.mubr.bf16.mxu0 %v1100_v24  ;;  %v5170_v22 = vsel %vm4084_vm0, 4294967295, %v5169_v22  ;;  %vm4103_vm6 = vmpackc.low %vm3400_vm4, %vm2916_vm7  ;;  %vm2917_vm7 = vcmp.ne.s32.totalorder %v445_v32, 0  ;;  %v707_v24 = vrot.slane %v3941_v3, 7 }
  0x88   : > { %5171 = vst [vmem:[#allocation11_spill] sm:$0xff] %v5170_v22  ;;  %v5174_v7 = vsel %vm4103_vm6, 4294967295, %v5173_v7 }
  0x89   : > { %5175 = vst [vmem:[#allocation12_spill] sm:$0xff] %v5174_v7  ;;  %v710_v18 = vsel %vm5180_vm12, %v707_v24, %v708_v35  ;;  %v711_v44 = vsel %vm5156_vm1, %v706_v48, %v707_v24  ;;  %v3345_v35 = vld [vmem:[%s5013_s1 + $0xc0] sm:$0xff]   ;;  %vm5185_vm12 = vcmp.lt.s32.totalorder %v3473_v15, 7 }
  0x8a   : > { %v2631_v3 = vpack.c.bf16 %v710_v18, %v711_v44  ;;  %3072 = vmatpush3.bf16.msra.mxu1 %v3345_v35 }
  0x8b   : > { %3073 = vmatprep.subr.bf16.mxu1 %v3346_v43 }
  0x8e   : > { %2620 = vmatmul.mubr.msk.bf16.gmra.mrb[48].mxu0 %vm4084_vm0, %v2619_v0  ;;  %vm4125_vm0 = vmpackc.low %vm3400_vm4, %vm2917_vm7  ;;  %vm2918_vm7 = vcmp.ne.s32.totalorder %v459_v9, 0  ;;  %v3347_v0 = vld [vmem:[%s5013_s1 + $0xc8] sm:$0xff]  }
  0x8f   : > { %1398 = vmatprep.mubr.bf16.mxu0 %v1103_v47  ;;  %v5178_v17 = vsel %vm4125_vm0, 4294967295, %v5177_v17  ;;  %3074 = vmatpush3.bf16.msra.mxu1 %v3347_v0  ;;  %v3349_v47 = vld [vmem:[%s5013_s1 + $0xd0] sm:$0xff]  }
  0x90   : > { %5179 = vst [vmem:[#allocation13_spill] sm:$0xff] %v5178_v17  ;;  %3075 = vmatprep.subr.bf16.mxu1 %v3348_v45 }
  0x93   : > { %3076 = vmatpush3.bf16.msra.mxu1 %v3349_v47 }
  0x94   : > { %3077 = vmatprep.subr.bf16.mxu1 %v3350_v50 }
  0x96   : > { %2624 = vmatmul.mubr.msk.bf16.gmra.mrb[52].mxu0 %vm4103_vm6, %v2623_v27  ;;  %vm4144_vm6 = vmpackc.low %vm3400_vm4, %vm2918_vm7 }
  0x97   : > { %1406 = vmatprep.mubr.bf16.mxu0 %v1106_v54  ;;  %v5182_v46 = vsel %vm4144_vm6, 4294967295, %v5181_v46  ;;  %3078 = vmatpush3.bf16.msra.mxu1 %v3351_v52  ;;  %v4192_v54 = vld [vmem:[%s5014_s2] ss:$0 sm:$0xff]  ;;  %vm5184_vm4 = vmmov %vm5156_vm1 }
  0x98   : > { %5183 = vst [vmem:[#allocation14_spill] sm:$0xff] %v5182_v46  ;;  %3079 = vmatprep.subr.bf16.mxu1 %v3352_v53  ;;  %vm5186_vm1 = vmmov %vm5185_vm12 }
  0x99   : > { %vm5187_vm7 = vmmov %vm5184_vm4 }
  0x9b   : > { %3080 = vmatpush3.bf16.msra.mxu1 %v3353_v63 }
  0x9c   : > { %3081 = vmatprep.subr.bf16.mxu1 %v3354_v21 }
  0x9e   : > { %2628 = vmatmul.mubr.msk.bf16.gmra.mrb[56].mxu0 %vm4125_vm0, %v2627_v11 }
  0x9f   : > { %1414 = vmatprep.mubr.bf16.mxu0 %v1109_v36  ;;  %3082 = vmatpush3.bf16.msra.mxu1 %v3355_v20  ;;  %v3358_v36 = vld [vmem:[%s5013_s1 + $0x138] sm:$0xff]  }
  0xa0   : > { %3083 = vmatprep.subr.bf16.mxu1 %v3356_v4 }
  0xa3   : > { %3084 = vmatpush3.bf16.msra.mxu1 %v3357_v16 }
  0xa4   : > { %3085 = vmatprep.subr.bf16.mxu1 %v3358_v36 }
  0xa6   : > { %2632 = vmatmul.mubr.msk.bf16.gmra.mrb[60].mxu0 %vm4144_vm6, %v2631_v3 }
  0xa7   : > { %3086 = vmatpush3.bf16.msra.mxu1 %v3359_v37 }
 0x101   : > { %v2951_v27 = vpop.f32.mrb[0].mxu0 }
 0x102   : > { %v2952_v48 = vpop.f32.mrb[1].mxu0 }
 0x103   : > { %v2953_v29 = vadd.f32 %v2952_v48, %v2951_v27  ;;  %v2954_v32 = vpop.f32.mrb[2].mxu0  ;;  %v3225_v23 = vpop.f32.mrb[0].mxu1 }
 0x104   : > { %v2955_v38 = vpop.f32.mrb[3].mxu0  ;;  %v1457_v11 = vpop.f32.mrb[1].mxu1 }
 0x105   : > { %v2956_v60 = vadd.f32 %v2955_v38, %v2954_v32  ;;  %v1297_v61 = vadd.f32 %v2953_v29, %v4192_v54  ;;  %v3226_v24 = vpop.f32.mrb[2].mxu1 }
 0x106   : > { %v1460_v44 = vpop.f32.mrb[3].mxu1 }
 0x107   : > { %v1458_v9 = vadd.f32 %v1457_v11, %v1297_v61  ;;  %v1300_v18 = vadd.f32 %v2956_v60, %v4192_v54 }
 0x109   : > { %v4205_v3 = vmax.f32 %v1458_v9, 0.0  ;;  %v1461_v28 = vadd.f32 %v1460_v44, %v1300_v18  ;;  %v2957_v35 = vpop.f32.mrb[4].mxu0 }
 0x10a   : > { %v2958_v43 = vpop.f32.mrb[5].mxu0 }
 0x10b   : > { %v1585_v0 = vmax.f32 %v1461_v28, 0.0  ;;  %v2959_v45 = vadd.f32 %v2958_v43, %v2957_v35  ;;  %v2960_v47 = vpop.f32.mrb[6].mxu0  ;;  %v4207_v52 = vpop.f32.mrb[4].mxu1  ;;  %v5039_v53 = vrot.slane %v4205_v3, 7 }
 0x10c   : > { %v2961_v50 = vpop.f32.mrb[7].mxu0  ;;  %v1473_v4 = vpop.f32.mrb[5].mxu1 }
 0x10d   : > { %v1666_v63 = vrot.slane %v1585_v0, 7  ;;  %v1305_v21 = vadd.f32 %v2959_v45, %v4192_v54  ;;  %v2962_v20 = vadd.f32 %v2961_v50, %v2960_v47  ;;  %v1858_v27 = vpack.c.bf16 %v1585_v0, %v4205_v3  ;;  %v4212_v48 = vpop.f32.mrb[6].mxu1 }
 0x10e   : > { %v1476_v38 = vpop.f32.mrb[7].mxu1  ;;  %v1762_v36 = vrot.slane %v1585_v0, 1 }
 0x10f   : > { %v4218_v16 = vsel %vm5184_vm4, %v5039_v53, %v1666_v63  ;;  %v1466_v29 = vadd.f32 %v3225_v23, %v1305_v21  ;;  %v1308_v32 = vadd.f32 %v2962_v20, %v4192_v54  ;;  %2089 = vmatprep.mubr.bf16.mxu1 %v1858_v27  ;;  %v5038_v23 = vrot.slane %v4205_v3, 1  ;;  %vm5188_vm4 = vmmov %vm5186_vm1 }
 0x111   : > { %v4221_v60 = vmax.f32 %v1466_v29, 0.0  ;;  %v1469_v61 = vadd.f32 %v3226_v24, %v1308_v32  ;;  %v2963_v11 = vpop.f32.mrb[8].mxu0  ;;  %v1823_v27 = vsel %vm5186_vm1, %v5038_v23, %v1762_v36 }
 0x112   : > { %v2964_v37 = vpop.f32.mrb[9].mxu0 }
 0x113   : > { %v1667_v9 = vrot.slane %v4221_v60, 7  ;;  %v1763_v18 = vrot.slane %v4221_v60, 1  ;;  %v4225_v44 = vmax.f32 %v1469_v61, 0.0  ;;  %v2965_v28 = vadd.f32 %v2964_v37, %v2963_v11  ;;  %v2966_v35 = vpop.f32.mrb[10].mxu0  ;;  %v4228_v45 = vpop.f32.mrb[8].mxu1 }
 0x114   : > { %v2967_v43 = vpop.f32.mrb[11].mxu0  ;;  %v4233_v21 = vpop.f32.mrb[9].mxu1 }
 0x115   : > { %v1668_v47 = vrot.slane %v4225_v44, 7  ;;  %v1764_v24 = vrot.slane %v4225_v44, 1  ;;  %v2968_v50 = vadd.f32 %v2967_v43, %v2966_v35  ;;  %v1313_v0 = vadd.f32 %v2965_v28, %v4192_v54  ;;  %v4241_v29 = vpop.f32.mrb[10].mxu1 }
 0x116   : > { %v1822_v20 = vsel %vm5185_vm12, %v1762_v36, %v1763_v18  ;;  %v4247_v61 = vsel %vm5187_vm7, %v1666_v63, %v1667_v9  ;;  %v1492_v43 = vpop.f32.mrb[11].mxu1  ;;  %vm5189_vm12 = vmmov %vm5187_vm7 }
 0x117   : > { %v1474_v11 = vadd.f32 %v1473_v4, %v1313_v0  ;;  %v1821_v37 = vsel %vm5188_vm4, %v1763_v18, %v1764_v24  ;;  %v1316_v28 = vadd.f32 %v2968_v50, %v4192_v54  ;;  %v2837_v35 = vpack.c.bf16 %v1822_v20, %v1823_v27 }
 0x118   : > { %v4254_v36 = vsel %vm5189_vm12, %v1667_v9, %v1668_v47 }
 0x119   : > { %v4256_v23 = vmax.f32 %v1474_v11, 0.0  ;;  %v1477_v53 = vadd.f32 %v1476_v38, %v1316_v28  ;;  %3271 = vmatprep.mubr.msk.bf16.mxu0 %vm3571_vm5, %v2837_v35  ;;  %v2969_v63 = vpop.f32.mrb[12].mxu0  ;;  %vm5190_vm5 = vmmov %vm5187_vm7  ;;  %v5271_v15 = vpack.c.bf16 %v4254_v36, %v4247_v61  ;;  %v5281_v36 = vld [vmem:[#allocation2_spill] sm:$0xff] }
 0x11a   : > { %v2970_v0 = vpop.f32.mrb[13].mxu0  ;;  %vm5191_vm7 = vmmov %vm5186_vm1 }
 0x11b   : > { %v1669_v18 = vrot.slane %v4256_v23, 7  ;;  %v1765_v50 = vrot.slane %v4256_v23, 1  ;;  %v4264_v20 = vmax.f32 %v1477_v53, 0.0  ;;  %v2971_v27 = vadd.f32 %v2970_v0, %v2969_v63  ;;  %v2972_v9 = vpop.f32.mrb[14].mxu0  ;;  %v4266_v11 = vpop.f32.mrb[12].mxu1  ;;  %vm5192_vm4 = vmmov %vm5190_vm5 }
 0x11c   : > { %v2973_v32 = vpop.f32.mrb[15].mxu0  ;;  %v4273_v4 = vpop.f32.mrb[13].mxu1  ;;  %vm5195_vm12 = vmmov %vm5192_vm4 }
 0x11d   : > { %v1820_v57 = vsel %vm5186_vm1, %v1764_v24, %v1765_v50  ;;  %v1670_v38 = vrot.slane %v4264_v20, 7  ;;  %v1766_v28 = vrot.slane %v4264_v20, 1  ;;  %v1321_v35 = vadd.f32 %v2971_v27, %v4192_v54  ;;  %v4275_v53 = vpop.f32.mrb[14].mxu1 }
 0x11e   : > { %v2841_v46 = vpack.c.bf16 %v1820_v57, %v1821_v37  ;;  %v2974_v17 = vadd.f32 %v2973_v32, %v2972_v9  ;;  %v4281_v0 = vsel %vm5190_vm5, %v1668_v47, %v1669_v18  ;;  %v4286_v22 = vpop.f32.mrb[15].mxu1  ;;  %vm5197_vm5 = vmmov %vm5192_vm4 }
 0x11f   : > { %v1482_v24 = vadd.f32 %v4207_v52, %v1321_v35  ;;  %v1819_v7 = vsel %vm5191_vm7, %v1765_v50, %v1766_v28  ;;  %v4290_v37 = vsel %vm5192_vm4, %v1669_v18, %v1670_v38  ;;  %vm5202_vm7 = vmmov %vm5192_vm4 }
 0x120   : > { %v1324_v32 = vadd.f32 %v2974_v17, %v4192_v54  ;;  %3272 = vmatmul.mubr.msk.bf16.vlgmr.msra.gmra.mrb[64].mxu0 %vm3617_vm9, %v2841_v46  ;;  %vm5194_vm9 = vmmov %vm5186_vm1 }
 0x121   : > { %v4297_v27 = vmax.f32 %v1482_v24, 0.0  ;;  %v2975_v52 = vpop.f32.mrb[16].mxu0  ;;  %vm5204_vm4 = vmmov %vm5186_vm1 }
 0x122   : > { %v1485_v9 = vadd.f32 %v4212_v48, %v1324_v32  ;;  %v2976_v50 = vpop.f32.mrb[17].mxu0 }
 0x123   : > { %5193 = vst [vmem:[#allocation15_spill] sm:$0xff] %v4297_v27  ;;  %v1671_v57 = vrot.slane %v4297_v27, 7  ;;  %v1767_v35 = vrot.slane %v4297_v27, 1  ;;  %v2977_v18 = vadd.f32 %v2976_v50, %v2975_v52  ;;  %v2978_v63 = vpop.f32.mrb[18].mxu0  ;;  %v4304_v13 = vpop.f32.mrb[16].mxu1 }
 0x124   : > { %v4302_v41 = vmax.f32 %v1485_v9, 0.0  ;;  %v2979_v17 = vpop.f32.mrb[19].mxu0  ;;  %v4309_v12 = vpop.f32.mrb[17].mxu1 }
 0x125   : > { %v2980_v46 = vadd.f32 %v2979_v17, %v2978_v63  ;;  %v1329_v47 = vadd.f32 %v2977_v18, %v4192_v54  ;;  %v1818_v24 = vsel %vm5194_vm9, %v1766_v28, %v1767_v35  ;;  %v4313_v48 = vsel %vm5195_vm12, %v1670_v38, %v1671_v57  ;;  %v4317_v50 = vpop.f32.mrb[18].mxu1  ;;  %vm5205_vm9 = vmmov %vm5197_vm5 }
 0x126   : > { %5196 = vst [vmem:[#allocation16_spill] sm:$0xff] %v4313_v48  ;;  %v1672_v32 = vrot.slane %v4302_v41, 7  ;;  %v1768_v52 = vrot.slane %v4302_v41, 1  ;;  %v2845_v9 = vpack.c.bf16 %v1818_v24, %v1819_v7  ;;  %v4323_v17 = vpop.f32.mrb[19].mxu1  ;;  %vm5210_vm12 = vmmov %vm5197_vm5 }
 0x127   : > { %v1490_v18 = vadd.f32 %v4233_v21, %v1329_v47  ;;  %v1332_v28 = vadd.f32 %v2980_v46, %v4192_v54 }
 0x128   : > { %3275 = vmatprep.mubr.msk.bf16.mxu0 %vm3626_vm10, %v2845_v9  ;;  %v1817_v38 = vsel %vm5186_vm1, %v1767_v35, %v1768_v52  ;;  %v4331_v7 = vsel %vm5197_vm5, %v1671_v57, %v1672_v32  ;;  %vm5201_vm10 = vmmov %vm5186_vm1 }
 0x129   : > { %5198 = vst [vmem:[#allocation17_spill] sm:$0xff] %v4331_v7  ;;  %v4333_v24 = vmax.f32 %v1490_v18, 0.0  ;;  %v1493_v39 = vadd.f32 %v1492_v43, %v1332_v28  ;;  %v2981_v63 = vpop.f32.mrb[20].mxu0 }
 0x12a   : > { %v2982_v47 = vpop.f32.mrb[21].mxu0  ;;  %v5276_v26 = vld [vmem:[#allocation15_spill] sm:$0xff] }
 0x12b   : > { %5199 = vst [vmem:[#allocation18_spill] sm:$0xff] %v4333_v24  ;;  %v1673_v46 = vrot.slane %v4333_v24, 7  ;;  %v1769_v19 = vrot.slane %v4333_v24, 1  ;;  %v4339_v9 = vmax.f32 %v1493_v39, 0.0  ;;  %v2983_v42 = vadd.f32 %v2982_v47, %v2981_v63  ;;  %v2984_v35 = vpop.f32.mrb[22].mxu0  ;;  %v4341_v8 = vpop.f32.mrb[20].mxu1 }
 0x12c   : > { %v2985_v33 = vpop.f32.mrb[23].mxu0  ;;  %v4346_v21 = vpop.f32.mrb[21].mxu1 }
 0x12d   : > { %5200 = vst [vmem:[#allocation19_spill] sm:$0xff] %v4339_v9  ;;  %v1674_v57 = vrot.slane %v4339_v9, 7  ;;  %v1770_v43 = vrot.slane %v4339_v9, 1  ;;  %v1337_v18 = vadd.f32 %v2983_v42, %v4192_v54  ;;  %v2986_v28 = vadd.f32 %v2985_v33, %v2984_v35  ;;  %v4350_v30 = vpop.f32.mrb[22].mxu1 }
 0x12e   : > { %v1816_v14 = vsel %vm5201_vm10, %v1768_v52, %v1769_v19  ;;  %v4356_v63 = vsel %vm5202_vm7, %v1672_v32, %v1673_v46  ;;  %v4362_v35 = vpop.f32.mrb[23].mxu1  ;;  %vm5215_vm10 = vmmov %vm5197_vm5 }
 0x12f   : > { %5203 = vst [vmem:[#allocation20_spill] sm:$0xff] %v4356_v63  ;;  %v1498_v47 = vadd.f32 %v4228_v45, %v1337_v18  ;;  %v1340_v49 = vadd.f32 %v2986_v28, %v4192_v54  ;;  %v2849_v42 = vpack.c.bf16 %v1816_v14, %v1817_v38  ;;  %v1815_v33 = vsel %vm5204_vm4, %v1769_v19, %v1770_v43  ;;  %vm5217_vm7 = vmmov %vm5186_vm1 }
 0x130   : > { %v4366_v52 = vsel %vm5205_vm9, %v1673_v46, %v1674_v57  ;;  %vm5218_vm4 = vmmov %vm5197_vm5 }
 0x131   : > { %5206 = vst [vmem:[#allocation21_spill] sm:$0xff] %v4366_v52  ;;  %v4368_v48 = vmax.f32 %v1498_v47, 0.0  ;;  %v1501_v39 = vadd.f32 %v4241_v29, %v1340_v49  ;;  %3276 = vmatmul.mubr.msk.bf16.gmra.mrb[68].mxu0 %vm3687_vm14, %v2849_v42  ;;  %v2987_v45 = vpop.f32.mrb[24].mxu0  ;;  %vm5209_vm14 = vmmov %vm5186_vm1 }
 0x132   : > { %v2988_v32 = vpop.f32.mrb[25].mxu0  ;;  %vm5220_vm9 = vmmov %vm5218_vm4 }
 0x133   : > { %5207 = vst [vmem:[#allocation22_spill] sm:$0xff] %v4368_v48  ;;  %v1675_v38 = vrot.slane %v4368_v48, 7  ;;  %v1771_v19 = vrot.slane %v4368_v48, 1  ;;  %v4377_v18 = vmax.f32 %v1501_v39, 0.0  ;;  %v2989_v46 = vadd.f32 %v2988_v32, %v2987_v45  ;;  %v2990_v28 = vpop.f32.mrb[26].mxu0  ;;  %v4379_v24 = vpop.f32.mrb[24].mxu1 }
 0x134   : > { %v2991_v47 = vpop.f32.mrb[27].mxu0  ;;  %v4384_v14 = vpop.f32.mrb[25].mxu1 }
 0x135   : > { %5208 = vst [vmem:[#allocation23_spill] sm:$0xff] %v4377_v18  ;;  %v1676_v49 = vrot.slane %v4377_v18, 7  ;;  %v1772_v51 = vrot.slane %v4377_v18, 1  ;;  %v2992_v29 = vadd.f32 %v2991_v47, %v2990_v28  ;;  %v1345_v42 = vadd.f32 %v2989_v46, %v4192_v54  ;;  %v4388_v52 = vpop.f32.mrb[26].mxu1 }
 0x136   : > { %v1814_v63 = vsel %vm5209_vm14, %v1770_v43, %v1771_v19  ;;  %v4394_v45 = vsel %vm5210_vm12, %v1674_v57, %v1675_v38  ;;  %v4400_v9 = vpop.f32.mrb[27].mxu1  ;;  %vm5222_vm14 = vmmov %vm5186_vm1 }
 0x137   : > { %5211 = vst [vmem:[#allocation24_spill] sm:$0xff] %v4394_v45  ;;  %v1506_v32 = vadd.f32 %v4273_v4, %v1345_v42  ;;  %v1348_v28 = vadd.f32 %v2992_v29, %v4192_v54  ;;  %v2853_v47 = vpack.c.bf16 %v1814_v63, %v1815_v33  ;;  %v1813_v46 = vsel %vm5186_vm1, %v1771_v19, %v1772_v51  ;;  %vm5223_vm12 = vmmov %vm5218_vm4 }
 0x138   : > { %v4404_v43 = vsel %vm5197_vm5, %v1675_v38, %v1676_v49 }
 0x139   : > { %5212 = vst [vmem:[#allocation25_spill] sm:$0xff] %v4404_v43  ;;  %v4406_v7 = vmax.f32 %v1506_v32, 0.0  ;;  %v1509_v39 = vadd.f32 %v4286_v22, %v1348_v28  ;;  %3279 = vmatprep.mubr.msk.bf16.mxu0 %vm3693_vm2, %v2853_v47  ;;  %v2993_v4 = vpop.f32.mrb[28].mxu0  ;;  %vm5214_vm2 = vmmov %vm5186_vm1 }
 0x13a   : > { %v2994_v63 = vpop.f32.mrb[29].mxu0  ;;  %vm5227_vm5 = vmmov %vm5214_vm2 }
 0x13b   : > { %5213 = vst [vmem:[#allocation26_spill] sm:$0xff] %v4406_v7  ;;  %v1677_v33 = vrot.slane %v4406_v7, 7  ;;  %v1773_v19 = vrot.slane %v4406_v7, 1  ;;  %v4415_v29 = vmax.f32 %v1509_v39, 0.0  ;;  %v2995_v38 = vadd.f32 %v2994_v63, %v2993_v4  ;;  %v2996_v42 = vpop.f32.mrb[30].mxu0  ;;  %v4417_v48 = vpop.f32.mrb[28].mxu1 }
 0x13c   : > { %v2997_v32 = vpop.f32.mrb[31].mxu0  ;;  %v4422_v57 = vpop.f32.mrb[29].mxu1 }
 0x13d   : > { %v1678_v22 = vrot.slane %v4415_v29, 7  ;;  %v1774_v55 = vrot.slane %v4415_v29, 1  ;;  %v1353_v28 = vadd.f32 %v2995_v38, %v4192_v54  ;;  %v2998_v47 = vadd.f32 %v2997_v32, %v2996_v42  ;;  %v4426_v43 = vpop.f32.mrb[30].mxu1 }
 0x13e   : > { %v1812_v45 = vsel %vm5214_vm2, %v1772_v51, %v1773_v19  ;;  %v4432_v4 = vsel %vm5215_vm10, %v1676_v49, %v1677_v33  ;;  %v4438_v32 = vpop.f32.mrb[31].mxu1 }
 0x13f   : > { %5216 = vst [vmem:[#allocation27_spill] sm:$0xff] %v4432_v4  ;;  %v1514_v63 = vadd.f32 %v4266_v11, %v1353_v28  ;;  %v1356_v18 = vadd.f32 %v2998_v47, %v4192_v54  ;;  %v2857_v38 = vpack.c.bf16 %v1812_v45, %v1813_v46  ;;  %v1811_v42 = vsel %vm5217_vm7, %v1773_v19, %v1774_v55 }
 0x140   : > { %v4442_v51 = vsel %vm5218_vm4, %v1677_v33, %v1678_v22 }
 0x141   : > { %v4444_v27 = vmax.f32 %v1514_v63, 0.0  ;;  %v1517_v39 = vadd.f32 %v4275_v53, %v1356_v18  ;;  %3280 = vmatmul.mubr.msk.bf16.gmra.mrb[72].mxu0 %vm3742_vm11, %v2857_v38  ;;  %v2999_v11 = vpop.f32.mrb[32].mxu0  ;;  %vm5219_vm11 = vmmov %vm5186_vm1 }
 0x142   : > { %v3000_v45 = vpop.f32.mrb[33].mxu0 }
 0x143   : > { %v1679_v46 = vrot.slane %v4444_v27, 7  ;;  %v1775_v19 = vrot.slane %v4444_v27, 1  ;;  %v4453_v28 = vmax.f32 %v1517_v39, 0.0  ;;  %v3001_v33 = vadd.f32 %v3000_v45, %v2999_v11  ;;  %v3002_v47 = vpop.f32.mrb[34].mxu0 }
 0x144   : > { %v3003_v63 = vpop.f32.mrb[35].mxu0 }
 0x145   : > { %v1680_v7 = vrot.slane %v4453_v28, 7  ;;  %v1776_v53 = vrot.slane %v4453_v28, 1  ;;  %v3004_v25 = vadd.f32 %v3003_v63, %v3002_v47  ;;  %v1361_v18 = vadd.f32 %v3001_v33, %v4192_v54 }
 0x146   : > { %v1810_v38 = vsel %vm5219_vm11, %v1774_v55, %v1775_v19  ;;  %v4464_v39 = vsel %vm5220_vm9, %v1678_v22, %v1679_v46  ;;  %vm5235_vm11 = vnez %v5108_v5 }
 0x147   : > { %5221 = vst [vmem:[#allocation28_spill] sm:$0xff] %v4464_v39  ;;  %v1522_v11 = vadd.f32 %v4309_v12, %v1361_v18  ;;  %v1364_v45 = vadd.f32 %v3004_v25, %v4192_v54  ;;  %v2861_v4 = vpack.c.bf16 %v1810_v38, %v1811_v42  ;;  %v1809_v47 = vsel %vm5222_vm14, %v1775_v19, %v1776_v53 }
 0x148   : > { %v4472_v33 = vsel %vm5223_vm12, %v1679_v46, %v1680_v7 }
 0x149   : > { %5224 = vst [vmem:[#allocation29_spill] sm:$0xff] %v4472_v33  ;;  %v4474_v55 = vmax.f32 %v1522_v11, 0.0  ;;  %v1525_v63 = vadd.f32 %v4323_v17, %v1364_v45  ;;  %3283 = vmatprep.mubr.msk.bf16.mxu0 %vm3755_vm15, %v2861_v4  ;;  %v3005_v22 = vpop.f32.mrb[36].mxu0  ;;  %vm5225_vm15 = vmmov %vm5186_vm1 }
 0x14a   : > { %v3006_v25 = vpop.f32.mrb[37].mxu0  ;;  %vm5226_vm1 = vmmov %vm5218_vm4 }
 0x14b   : > { %v1681_v42 = vrot.slane %v4474_v55, 7  ;;  %v1777_v19 = vrot.slane %v4474_v55, 1  ;;  %v4483_v18 = vmax.f32 %v1525_v63, 0.0  ;;  %v3007_v46 = vadd.f32 %v3006_v25, %v3005_v22  ;;  %v3008_v38 = vpop.f32.mrb[38].mxu0  ;;  %vm5228_vm2 = vmmov %vm5226_vm1 }
 0x14c   : > { %v3009_v11 = vpop.f32.mrb[39].mxu0  ;;  %vm5230_vm10 = vmmov %vm5226_vm1 }
 0x14d   : > { %v1682_v49 = vrot.slane %v4483_v18, 7  ;;  %v1778_v17 = vrot.slane %v4483_v18, 1  ;;  %v1369_v34 = vadd.f32 %v3007_v46, %v4192_v54  ;;  %v3010_v4 = vadd.f32 %v3009_v11, %v3008_v38  ;;  %vm5233_vm4 = vmmov %vm5226_vm1 }
 0x14e   : > { %v1808_v45 = vsel %vm5225_vm15, %v1776_v53, %v1777_v19  ;;  %v4494_v63 = vsel %vm5226_vm1, %v1680_v7, %v1681_v42  ;;  %vm5237_vm14 = vmmov %vm5226_vm1 }
 0x14f   : > { %v1530_v22 = vadd.f32 %v4304_v13, %v1369_v34  ;;  %v1372_v25 = vadd.f32 %v3010_v4, %v4192_v54  ;;  %v2865_v39 = vpack.c.bf16 %v1808_v45, %v1809_v47  ;;  %v1807_v33 = vsel %vm5227_vm5, %v1777_v19, %v1778_v17  ;;  %vm5239_vm15 = vmmov %vm5226_vm1 }
 0x150   : > { %v4502_v46 = vsel %vm5228_vm2, %v1681_v42, %v1682_v49  ;;  %vm5240_vm1 = vnez %v5116_v31 }
 0x151   : > { %v4504_v53 = vmax.f32 %v1530_v22, 0.0  ;;  %v1533_v38 = vadd.f32 %v4317_v50, %v1372_v25  ;;  %3284 = vmatmul.mubr.msk.bf16.gmra.mrb[76].mxu0 %vm3802_vm3, %v2865_v39  ;;  %v3011_v7 = vpop.f32.mrb[40].mxu0  ;;  %vm5229_vm3 = vmmov %vm5227_vm5 }
 0x152   : > { %v3012_v11 = vpop.f32.mrb[41].mxu0  ;;  %vm5232_vm7 = vmmov %vm5229_vm3 }
 0x153   : > { %v1683_v47 = vrot.slane %v4504_v53, 7  ;;  %v1779_v19 = vrot.slane %v4504_v53, 1  ;;  %v4513_v34 = vmax.f32 %v1533_v38, 0.0  ;;  %v3013_v42 = vadd.f32 %v3012_v11, %v3011_v7  ;;  %v3014_v4 = vpop.f32.mrb[42].mxu0  ;;  %vm5236_vm9 = vmmov %vm5229_vm3 }
 0x154   : > { %v3015_v45 = vpop.f32.mrb[43].mxu0  ;;  %vm5238_vm12 = vmmov %vm5229_vm3 }
 0x155   : > { %v1684_v22 = vrot.slane %v4513_v34, 7  ;;  %v1780_v50 = vrot.slane %v4513_v34, 1  ;;  %v3016_v2 = vadd.f32 %v3015_v45, %v3014_v4  ;;  %v1377_v39 = vadd.f32 %v3013_v42, %v4192_v54  ;;  %vm5241_vm5 = vmmov %vm5229_vm3 }
 0x156   : > { %v1806_v25 = vsel %vm5229_vm3, %v1778_v17, %v1779_v19  ;;  %v4524_v38 = vsel %vm5230_vm10, %v1682_v49, %v1683_v47  ;;  %vm5243_vm10 = vmmov %vm5228_vm2 }
 0x157   : > { %5231 = vst [vmem:[#allocation30_spill] sm:$0xff] %v4524_v38  ;;  %v1538_v7 = vadd.f32 %v4346_v21, %v1377_v39  ;;  %v1380_v11 = vadd.f32 %v3016_v2, %v4192_v54  ;;  %v2869_v12 = vpack.c.bf16 %v1806_v25, %v1807_v33  ;;  %v1805_v4 = vsel %vm5232_vm7, %v1779_v19, %v1780_v50 }
 0x158   : > { %v4532_v42 = vsel %vm5233_vm4, %v1683_v47, %v1684_v22  ;;  %vm5245_vm7 = vnez %v5119_v6  ;;  %vm5246_vm4 = vmmov %vm5229_vm3 }
 0x159   : > { %5234 = vst [vmem:[#allocation31_spill] sm:$0xff] %v4532_v42  ;;  %v4534_v17 = vmax.f32 %v1538_v7, 0.0  ;;  %v1541_v45 = vadd.f32 %v4362_v35, %v1380_v11  ;;  %3287 = vmatprep.mubr.msk.bf16.mxu0 %vm5235_vm11, %v2869_v12  ;;  %v3017_v49 = vpop.f32.mrb[44].mxu0  ;;  %vm5247_vm11 = vmmov %vm5228_vm2 }
 0x15a   : > { %v3018_v2 = vpop.f32.mrb[45].mxu0 }
 0x15b   : > { %v1685_v33 = vrot.slane %v4534_v17, 7  ;;  %v1781_v19 = vrot.slane %v4534_v17, 1  ;;  %v4543_v39 = vmax.f32 %v1541_v45, 0.0  ;;  %v3019_v47 = vadd.f32 %v3018_v2, %v3017_v49  ;;  %v3020_v25 = vpop.f32.mrb[46].mxu0 }
 0x15c   : > { %v3021_v7 = vpop.f32.mrb[47].mxu0 }
 0x15d   : > { %v1686_v13 = vrot.slane %v4543_v39, 7  ;;  %v1782_v35 = vrot.slane %v4543_v39, 1  ;;  %v1385_v5 = vadd.f32 %v3019_v47, %v4192_v54  ;;  %v3022_v12 = vadd.f32 %v3021_v7, %v3020_v25 }
 0x15e   : > { %v1804_v11 = vsel %vm5236_vm9, %v1780_v50, %v1781_v19  ;;  %v4554_v45 = vsel %vm5237_vm14, %v1684_v22, %v1685_v33  ;;  %vm5248_vm9 = vmmov %vm5229_vm3 }
 0x15f   : > { %v1546_v49 = vadd.f32 %v4341_v8, %v1385_v5  ;;  %v1388_v2 = vadd.f32 %v3022_v12, %v4192_v54  ;;  %v2873_v38 = vpack.c.bf16 %v1804_v11, %v1805_v4  ;;  %v1803_v42 = vsel %vm5238_vm12, %v1781_v19, %v1782_v35  ;;  %vm5249_vm14 = vmmov %vm5228_vm2 }
 0x160   : > { %v4562_v47 = vsel %vm5239_vm15, %v1685_v33, %v1686_v13  ;;  %vm5250_vm12 = vnez %v5127_v58  ;;  %vm5251_vm15 = vmmov %vm5229_vm3 }
 0x161   : > { %v4564_v50 = vmax.f32 %v1546_v49, 0.0  ;;  %v1549_v25 = vadd.f32 %v4350_v30, %v1388_v2  ;;  %3288 = vmatmul.mubr.msk.bf16.gmra.mrb[80].mxu0 %vm5240_vm1, %v2873_v38  ;;  %v3023_v22 = vpop.f32.mrb[48].mxu0  ;;  %vm5252_vm1 = vmmov %vm5228_vm2 }
 0x162   : > { %v3024_v7 = vpop.f32.mrb[49].mxu0 }
 0x163   : > { %v1687_v4 = vrot.slane %v4564_v50, 7  ;;  %v1783_v19 = vrot.slane %v4564_v50, 1  ;;  %v4573_v5 = vmax.f32 %v1549_v25, 0.0  ;;  %v3025_v33 = vadd.f32 %v3024_v7, %v3023_v22  ;;  %v3026_v12 = vpop.f32.mrb[50].mxu0 }
 0x164   : > { %v3027_v11 = vpop.f32.mrb[51].mxu0 }
 0x165   : > { %v1688_v49 = vrot.slane %v4573_v5, 7  ;;  %v1784_v30 = vrot.slane %v4573_v5, 1  ;;  %v3028_v31 = vadd.f32 %v3027_v11, %v3026_v12  ;;  %v1393_v38 = vadd.f32 %v3025_v33, %v4192_v54 }
 0x166   : > { %v1802_v2 = vsel %vm5241_vm5, %v1782_v35, %v1783_v19  ;;  %v4584_v25 = vsel %vm5228_vm2, %v1686_v13, %v1687_v4  ;;  %vm5254_vm5 = vmmov %vm5229_vm3 }
 0x167   : > { %5242 = vst [vmem:[#allocation32_spill] sm:$0xff] %v4584_v25  ;;  %v1554_v22 = vadd.f32 %v4384_v14, %v1393_v38  ;;  %v1396_v7 = vadd.f32 %v3028_v31, %v4192_v54  ;;  %v2877_v21 = vpack.c.bf16 %v1802_v2, %v1803_v42  ;;  %v1801_v12 = vsel %vm5229_vm3, %v1783_v19, %v1784_v30  ;;  %vm5255_vm2 = vmmov %vm5252_vm1 }
 0x168   : > { %v4592_v33 = vsel %vm5243_vm10, %v1687_v4, %v1688_v49  ;;  %vm5257_vm3 = vnez %v5131_v59  ;;  %vm5258_vm10 = vmmov %vm5246_vm4 }
 0x169   : > { %5244 = vst [vmem:[#allocation33_spill] sm:$0xff] %v4592_v33  ;;  %v4594_v35 = vmax.f32 %v1554_v22, 0.0  ;;  %v1557_v11 = vadd.f32 %v4400_v9, %v1396_v7  ;;  %3291 = vmatprep.mubr.msk.bf16.mxu0 %vm5245_vm7, %v2877_v21  ;;  %v3029_v13 = vpop.f32.mrb[52].mxu0  ;;  %vm5259_vm7 = vmmov %vm5252_vm1 }
 0x16a   : > { %v3030_v31 = vpop.f32.mrb[53].mxu0 }
 0x16b   : > { %v1689_v42 = vrot.slane %v4594_v35, 7  ;;  %v1785_v19 = vrot.slane %v4594_v35, 1  ;;  %v4603_v38 = vmax.f32 %v1557_v11, 0.0  ;;  %v3031_v4 = vadd.f32 %v3030_v31, %v3029_v13  ;;  %v3032_v2 = vpop.f32.mrb[54].mxu0 }
 0x16c   : > { %v3033_v22 = vpop.f32.mrb[55].mxu0 }
 0x16d   : > { %v1690_v8 = vrot.slane %v4603_v38, 7  ;;  %v1786_v9 = vrot.slane %v4603_v38, 1  ;;  %v1401_v6 = vadd.f32 %v3031_v4, %v4192_v54  ;;  %v3034_v21 = vadd.f32 %v3033_v22, %v3032_v2 }
 0x16e   : > { %v1800_v7 = vsel %vm5246_vm4, %v1784_v30, %v1785_v19  ;;  %v4614_v11 = vsel %vm5247_vm11, %v1688_v49, %v1689_v42  ;;  %vm5260_vm11 = vmmov %vm5252_vm1 }
 0x16f   : > { %v1562_v13 = vadd.f32 %v4379_v24, %v1401_v6  ;;  %v1404_v31 = vadd.f32 %v3034_v21, %v4192_v54  ;;  %v2881_v25 = vpack.c.bf16 %v1800_v7, %v1801_v12  ;;  %v1799_v33 = vsel %vm5248_vm9, %v1785_v19, %v1786_v9  ;;  %vm5261_vm9 = vmmov %vm5246_vm4 }
 0x170   : > { %v4622_v4 = vsel %vm5249_vm14, %v1689_v42, %v1690_v8  ;;  %vm5262_vm14 = vmmov %vm5252_vm1 }
 0x171   : > { %v4624_v30 = vmax.f32 %v1562_v13, 0.0  ;;  %v1565_v2 = vadd.f32 %v4388_v52, %v1404_v31  ;;  %3292 = vmatmul.mubr.msk.bf16.gmra.mrb[84].mxu0 %vm5250_vm12, %v2881_v25  ;;  %v3035_v49 = vpop.f32.mrb[56].mxu0  ;;  %vm5264_vm12 = vmmov %vm5252_vm1 }
 0x172   : > { %v3036_v22 = vpop.f32.mrb[57].mxu0 }
 0x173   : > { %v1691_v12 = vrot.slane %v4624_v30, 7  ;;  %v1787_v19 = vrot.slane %v4624_v30, 1  ;;  %v4633_v6 = vmax.f32 %v1565_v2, 0.0  ;;  %v3037_v42 = vadd.f32 %v3036_v22, %v3035_v49  ;;  %v3038_v21 = vpop.f32.mrb[58].mxu0 }
 0x174   : > { %v3039_v7 = vpop.f32.mrb[59].mxu0 }
 0x175   : > { %v1692_v13 = vrot.slane %v4633_v6, 7  ;;  %v1788_v52 = vrot.slane %v4633_v6, 1  ;;  %v3040_v58 = vadd.f32 %v3039_v7, %v3038_v21  ;;  %v1409_v25 = vadd.f32 %v3037_v42, %v4192_v54 }
 0x176   : > { %v1798_v31 = vsel %vm5251_vm15, %v1786_v9, %v1787_v19  ;;  %v4644_v2 = vsel %vm5252_vm1, %v1690_v8, %v1691_v12  ;;  %vm5267_vm15 = vmmov %vm5246_vm4 }
 0x177   : > { %5253 = vst [vmem:[#allocation34_spill] sm:$0xff] %v4644_v2  ;;  %v1570_v49 = vadd.f32 %v4422_v57, %v1409_v25  ;;  %v1412_v22 = vadd.f32 %v3040_v58, %v4192_v54  ;;  %v2885_v14 = vpack.c.bf16 %v1798_v31, %v1799_v33  ;;  %v1797_v21 = vsel %vm5254_vm5, %v1787_v19, %v1788_v52 }
 0x178   : > { %v4652_v42 = vsel %vm5255_vm2, %v1691_v12, %v1692_v13  ;;  %vm5268_vm5 = vnez %v5142_v56  ;;  %vm5269_vm2 = vnez %v5081_v1  ;;  %v5273_v56 = vpack.c.bf16 %v4264_v20, %v4256_v23  ;;  %v5286_v20 = vld [vmem:[#allocation21_spill] sm:$0xff] }
 0x179   : > { %5256 = vst [vmem:[#allocation35_spill] sm:$0xff] %v4652_v42  ;;  %v4654_v9 = vmax.f32 %v1570_v49, 0.0  ;;  %v1573_v7 = vadd.f32 %v4438_v32, %v1412_v22  ;;  %3295 = vmatprep.mubr.msk.bf16.mxu0 %vm5257_vm3, %v2885_v14  ;;  %v3041_v8 = vpop.f32.mrb[60].mxu0  ;;  %vm5272_vm3 = vnez %v5091_v40  ;;  %v5274_v1 = vpack.c.bf16 %v4290_v37, %v4281_v0  ;;  %v5283_v40 = vld [vmem:[#allocation19_spill] sm:$0xff] }
 0x17a   : > { %v3042_v58 = vpop.f32.mrb[61].mxu0  ;;  %v5289_v37 = vld [vmem:[#allocation3_spill] sm:$0xff] }
 0x17b   : > { %v1693_v33 = vrot.slane %v4654_v9, 7  ;;  %v1789_v19 = vrot.slane %v4654_v9, 1  ;;  %v4663_v25 = vmax.f32 %v1573_v7, 0.0  ;;  %v3043_v12 = vadd.f32 %v3042_v58, %v3041_v8  ;;  %v3044_v31 = vpop.f32.mrb[62].mxu0 }
 0x17c   : > { %v3045_v49 = vpop.f32.mrb[63].mxu0 }
 0x17d   : > { %v1694_v24 = vrot.slane %v4663_v25, 7  ;;  %v1790_v32 = vrot.slane %v4663_v25, 1  ;;  %v1417_v59 = vadd.f32 %v3043_v12, %v4192_v54  ;;  %v3046_v14 = vadd.f32 %v3045_v49, %v3044_v31 }
 0x17e   : > { %v1796_v22 = vsel %vm5258_vm10, %v1788_v52, %v1789_v19  ;;  %v1900_v57 = vpack.c.bf16 %v4663_v25, %v4654_v9  ;;  %v1700_v7 = vsel %vm5259_vm7, %v1692_v13, %v1693_v33  ;;  %vm5275_vm10 = vnez %v5097_v10  ;;  %v5291_v10 = vld [vmem:[#allocation23_spill] sm:$0xff] }
 0x17f   : > { %v1578_v8 = vadd.f32 %v4417_v48, %v1417_v59  ;;  %v1420_v58 = vadd.f32 %v3046_v14, %v4192_v54  ;;  %v2889_v2 = vpack.c.bf16 %v1796_v22, %v1797_v21  ;;  %v1795_v42 = vsel %vm5246_vm4, %v1789_v19, %v1790_v32 }
 0x180   : > { %v1699_v12 = vsel %vm5260_vm11, %v1693_v33, %v1694_v24  ;;  %v5263_v14 = vrot.slane %v4205_v3, 7  ;;  %vm5290_vm7 = vnez %v5289_v37 }
 0x181   : > { %v1614_v31 = vmax.f32 %v1578_v8, 0.0  ;;  %v1581_v52 = vadd.f32 %v4426_v43, %v1420_v58  ;;  %3296 = vmatmul.mubr.msk.bf16.gmra.mrb[88].mxu0 %vm3960_vm13, %v2889_v2  ;;  %v2829_v9 = vpack.c.bf16 %v1699_v12, %v1700_v7  ;;  %vm5265_vm13 = vmmov %vm5246_vm4  ;;  %v5266_v2 = vrot.slane %v4205_v3, 1  ;;  %v5284_v8 = vld [vmem:[#allocation18_spill] sm:$0xff]  ;;  %v5287_v58 = vld [vmem:[#allocation20_spill] sm:$0xff] }
 0x182   : > { %v5270_v3 = vpack.c.bf16 %v4225_v44, %v4221_v60  ;;  %v5278_v60 = vld [vmem:[#allocation17_spill] sm:$0xff]  ;;  %v5279_v44 = vld [vmem:[#allocation16_spill] sm:$0xff]  ;;  %v5285_v23 = vpack.c.bf16 %v5283_v40, %v5284_v8  ;;  %v5288_v0 = vpack.c.bf16 %v5286_v20, %v5287_v58  ;;  %v5292_v12 = vld [vmem:[#allocation22_spill] sm:$0xff] }
 0x183   : > { %v1695_v25 = vrot.slane %v1614_v31, 7  ;;  %v1791_v13 = vrot.slane %v1614_v31, 1  ;;  %v1615_v49 = vmax.f32 %v1581_v52, 0.0  ;;  %v5280_v61 = vpack.c.bf16 %v5278_v60, %v5279_v44  ;;  %v5295_v52 = vld [vmem:[#allocation24_spill] sm:$0xff] }
 0x185   : > { %v1696_v48 = vrot.slane %v1615_v49, 7  ;;  %v1792_v59 = vrot.slane %v1615_v49, 1  ;;  %v1794_v54 = vsel %vm5261_vm9, %v1790_v32, %v1791_v13  ;;  %v1903_v21 = vpack.c.bf16 %v1615_v49, %v1614_v31  ;;  %v5294_v31 = vld [vmem:[#allocation25_spill] sm:$0xff]  ;;  %v5299_v49 = vld [vmem:[#allocation26_spill] sm:$0xff] }
 0x186   : > { %v2893_v19 = vpack.c.bf16 %v1794_v54, %v1795_v42  ;;  %v1698_v33 = vsel %vm5262_vm14, %v1694_v24, %v1695_v25 }
 0x187   : > { %v1728_v62 = vsel %vm5264_vm12, %v1696_v48, %v5263_v14  ;;  %v1793_v43 = vsel %vm5265_vm13, %v1791_v13, %v1792_v59  ;;  %v1824_v22 = vsel %vm5267_vm15, %v1792_v59, %v5266_v2  ;;  %v1697_v32 = vsel %vm5252_vm1, %v1695_v25, %v1696_v48  ;;  %v5297_v13 = vld [vmem:[#allocation4_spill] sm:$0xff]  ;;  %v5301_v59 = vld [vmem:[#allocation27_spill] sm:$0xff]  ;;  %v5306_v14 = vld [vmem:[#allocation29_spill] sm:$0xff] }
 0x188   : > { %v2773_v42 = vpack.c.bf16 %v4218_v16, %v1728_v62  ;;  %3299 = vmatprep.mubr.msk.bf16.mxu0 %vm5268_vm5, %v2893_v19  ;;  %v2897_v24 = vpack.c.bf16 %v1824_v22, %v1793_v43  ;;  %v2833_v7 = vpack.c.bf16 %v1697_v32, %v1698_v33  ;;  %v5277_v16 = vpack.c.bf16 %v4302_v41, %v5276_v26  ;;  %v5303_v19 = vld [vmem:[#allocation5_spill] sm:$0xff]  ;;  %v5307_v62 = vld [vmem:[#allocation28_spill] sm:$0xff]  ;;  %v5309_v2 = vld [vmem:[#allocation6_spill] sm:$0xff] }
 0x189   : > { %v5293_v41 = vpack.c.bf16 %v5291_v10, %v5292_v12  ;;  %v5296_v25 = vpack.c.bf16 %v5294_v31, %v5295_v52  ;;  %vm5298_vm4 = vnez %v5297_v13  ;;  %v5300_v48 = vpack.c.bf16 %v4415_v29, %v5299_v49  ;;  %v5313_v22 = vld [vmem:[#allocation7_spill] sm:$0xff]  ;;  %v5317_v32 = vld [vmem:[#allocation30_spill] sm:$0xff] }
 0x18a   : > { %2774 = vmatmul.mubr.msk.bf16.vlgmr.msra.gmra.mrb[32].mxu1 %vm5269_vm2, %v2773_v42  ;;  %3300 = vmatmul.mubr.msk.bf16.gmra.mrb[92].mxu0 %vm3999_vm8, %v2897_v24  ;;  %vm5282_vm8 = vnez %v5281_v36  ;;  %v5302_v54 = vpack.c.bf16 %v4442_v51, %v5301_v59  ;;  %vm5304_vm11 = vnez %v5303_v19  ;;  %v5305_v33 = vpack.c.bf16 %v4453_v28, %v4444_v27  ;;  %v5316_v28 = vld [vmem:[#allocation31_spill] sm:$0xff]  ;;  %v5319_v24 = vld [vmem:[#allocation8_spill] sm:$0xff]  ;;  %v4869_v59 = vld [vmem:[%s5014_s2 + $0x1] ss:$0 sm:$0xff] }
 0x18b   : > { %2097 = vmatprep.mubr.bf16.mxu1 %v5270_v3  ;;  %v5308_v43 = vpack.c.bf16 %v5306_v14, %v5307_v62  ;;  %vm5310_vm9 = vnez %v5309_v2  ;;  %v5311_v29 = vpack.c.bf16 %v4483_v18, %v4474_v55  ;;  %v5312_v51 = vpack.c.bf16 %v4502_v46, %v4494_v63  ;;  %v5323_v63 = vld [vmem:[#allocation9_spill] sm:$0xff] }
 0x18c   : > { %vm5314_vm14 = vnez %v5313_v22  ;;  %v5315_v27 = vpack.c.bf16 %v4513_v34, %v4504_v53  ;;  %v5318_v42 = vpack.c.bf16 %v5316_v28, %v5317_v32  ;;  %vm5320_vm12 = vnez %v5319_v24  ;;  %v5326_v53 = vld [vmem:[#allocation33_spill] sm:$0xff]  ;;  %v5327_v34 = vld [vmem:[#allocation32_spill] sm:$0xff]  ;;  %v3360_v28 = vld [vmem:[%s3497_s4] sm:$0xff] }
 0x18d   : > { %v5321_v55 = vpack.c.bf16 %v4543_v39, %v4534_v17  ;;  %v5322_v18 = vpack.c.bf16 %v4562_v47, %v4554_v45  ;;  %vm5324_vm13 = vnez %v5323_v63  ;;  %v5325_v46 = vpack.c.bf16 %v4573_v5, %v4564_v50  ;;  %v5333_v45 = vld [vmem:[#allocation11_spill] sm:$0xff]  ;;  %v5337_v5 = vld [vmem:[#allocation34_spill] sm:$0xff] }
 0x18e   : > { %v5328_v3 = vpack.c.bf16 %v5326_v53, %v5327_v34  ;;  %v5331_v17 = vpack.c.bf16 %v4603_v38, %v4594_v35  ;;  %v5332_v39 = vpack.c.bf16 %v4622_v4, %v4614_v11  ;;  %vm5334_vm1 = vnez %v5333_v45  ;;  %v5336_v50 = vld [vmem:[#allocation35_spill] sm:$0xff]  ;;  %v3363_v11 = vld [vmem:[%s3497_s4 + $0x18] sm:$0xff] }
 0x18f   : > { %v5335_v47 = vpack.c.bf16 %v4633_v6, %v4624_v30  ;;  %v3361_v63 = vld [vmem:[%s3497_s4 + $0x8] sm:$0xff] }
 0x192   : > { %2778 = vmatmul.mubr.msk.bf16.gmra.mrb[36].mxu1 %vm5272_vm3, %v5271_v15  ;;  %v5329_v15 = vld [vmem:[#allocation10_spill] sm:$0xff] }
 0x193   : > { %2105 = vmatprep.mubr.bf16.mxu1 %v5273_v56  ;;  %vm5330_vm15 = vnez %v5329_v15  ;;  %v5338_v56 = vpack.c.bf16 %v5336_v50, %v5337_v5  ;;  %v3362_v50 = vld [vmem:[%s3497_s4 + $0x10] sm:$0xff] }
 0x19a   : > { %2782 = vmatmul.mubr.msk.bf16.gmra.mrb[40].mxu1 %vm5275_vm10, %v5274_v1  ;;  %v5339_v1 = vld [vmem:[#allocation12_spill] sm:$0xff] }
 0x19b   : > { %2113 = vmatprep.mubr.bf16.mxu1 %v5277_v16  ;;  %vm5340_vm5 = vnez %v5339_v1 }
 0x1a2   : > { %2786 = vmatmul.mubr.msk.bf16.gmra.mrb[44].mxu1 %vm5282_vm8, %v5280_v61 }
 0x1a3   : > { %2121 = vmatprep.mubr.bf16.mxu1 %v5285_v23 }
 0x1aa   : > { %2790 = vmatmul.mubr.msk.bf16.gmra.mrb[48].mxu1 %vm5290_vm7, %v5288_v0 }
 0x1ab   : > { %2129 = vmatprep.mubr.bf16.mxu1 %v5293_v41 }
 0x1b2   : > { %2794 = vmatmul.mubr.msk.bf16.gmra.mrb[52].mxu1 %vm5298_vm4, %v5296_v25 }
 0x1b3   : > { %2137 = vmatprep.mubr.bf16.mxu1 %v5300_v48 }
 0x1ba   : > { %2798 = vmatmul.mubr.msk.bf16.gmra.mrb[56].mxu1 %vm5304_vm11, %v5302_v54 }
 0x1bb   : > { %2145 = vmatprep.mubr.bf16.mxu1 %v5305_v33 }
 0x1c2   : > { %2802 = vmatmul.mubr.msk.bf16.gmra.mrb[60].mxu1 %vm5310_vm9, %v5308_v43 }
 0x1c3   : > { %2153 = vmatprep.mubr.bf16.mxu1 %v5311_v29 }
 0x1ca   : > { %2806 = vmatmul.mubr.msk.bf16.gmra.mrb[64].mxu1 %vm5314_vm14, %v5312_v51 }
 0x1cb   : > { %2161 = vmatprep.mubr.bf16.mxu1 %v5315_v27 }
 0x1d2   : > { %2810 = vmatmul.mubr.msk.bf16.gmra.mrb[68].mxu1 %vm5320_vm12, %v5318_v42 }
 0x1d3   : > { %2169 = vmatprep.mubr.bf16.mxu1 %v5321_v55 }
 0x1da   : > { %2814 = vmatmul.mubr.msk.bf16.gmra.mrb[72].mxu1 %vm5324_vm13, %v5322_v18 }
 0x1db   : > { %2177 = vmatprep.mubr.bf16.mxu1 %v5325_v46 }
 0x1e2   : > { %2818 = vmatmul.mubr.msk.bf16.gmra.mrb[76].mxu1 %vm5330_vm15, %v5328_v3 }
 0x1e3   : > { %2185 = vmatprep.mubr.bf16.mxu1 %v5331_v17 }
 0x1ea   : > { %2822 = vmatmul.mubr.msk.bf16.gmra.mrb[80].mxu1 %vm5334_vm1, %v5332_v39 }
 0x1eb   : > { %2193 = vmatprep.mubr.bf16.mxu1 %v5335_v47 }
 0x1f2   : > { %2826 = vmatmul.mubr.msk.bf16.gmra.mrb[84].mxu1 %vm5340_vm5, %v5338_v56 }
 0x1f3   : > { %2201 = vmatprep.mubr.bf16.mxu1 %v1900_v57  ;;  %v3273_v26 = vpop.f32.mrb[64].mxu0 }
 0x1f4   : > { %v2252_v35 = vpop.f32.mrb[65].mxu0 }
 0x1f5   : > { %v4810_v38 = vpop.f32.mrb[66].mxu0 }
 0x1f6   : > { %v2255_v16 = vpop.f32.mrb[67].mxu0 }
 0x1fa   : > { %2830 = vmatmul.mubr.msk.bf16.gmra.mrb[88].mxu1 %vm4125_vm0, %v2829_v9 }
 0x1fb   : > { %2209 = vmatprep.mubr.bf16.mxu1 %v1903_v21 }
 0x202   : > { %2834 = vmatmul.mubr.msk.bf16.gmra.mrb[92].mxu1 %vm4144_vm6, %v2833_v7 }
 0x204   : > { %v4816_v30 = vpop.f32.mrb[68].mxu0 }
 0x205   : > { %v4818_v6 = vpop.f32.mrb[69].mxu0 }
 0x206   : > { %v4820_v60 = vpop.f32.mrb[70].mxu0 }
 0x207   : > { %v4822_v44 = vpop.f32.mrb[71].mxu0 }
 0x214   : > { %v4824_v57 = vpop.f32.mrb[72].mxu0 }
 0x215   : > { %v4826_v61 = vpop.f32.mrb[73].mxu0 }
 0x216   : > { %v4828_v36 = vpop.f32.mrb[74].mxu0 }
 0x217   : > { %v4830_v40 = vpop.f32.mrb[75].mxu0 }
 0x224   : > { %v4832_v9 = vpop.f32.mrb[76].mxu0 }
 0x225   : > { %v4834_v21 = vpop.f32.mrb[77].mxu0 }
 0x226   : > { %v4836_v7 = vpop.f32.mrb[78].mxu0 }
 0x227   : > { %v4838_v8 = vpop.f32.mrb[79].mxu0 }
 0x234   : > { %v4840_v23 = vpop.f32.mrb[80].mxu0 }
 0x235   : > { %v4842_v20 = vpop.f32.mrb[81].mxu0 }
 0x236   : > { %v4844_v58 = vpop.f32.mrb[82].mxu0 }
 0x237   : > { %v4846_v0 = vpop.f32.mrb[83].mxu0 }
 0x244   : > { %v4848_v37 = vpop.f32.mrb[84].mxu0 }
 0x245   : > { %v4850_v10 = vpop.f32.mrb[85].mxu0 }
 0x246   : > { %v4852_v12 = vpop.f32.mrb[86].mxu0 }
 0x247   : > { %v4854_v41 = vpop.f32.mrb[87].mxu0 }
 0x254   : > { %v4856_v31 = vpop.f32.mrb[88].mxu0 }
 0x255   : > { %v4858_v52 = vpop.f32.mrb[89].mxu0 }
 0x256   : > { %v4860_v25 = vpop.f32.mrb[90].mxu0 }
 0x257   : > { %v4862_v13 = vpop.f32.mrb[91].mxu0 }
 0x25d   : > { %v3087_v49 = vpop.f32.mrb[32].mxu1  ;;  %v4864_v48 = vpop.f32.mrb[92].mxu0 }
 0x25e   : > { %v3088_v54 = vpop.f32.mrb[33].mxu1  ;;  %v4871_v19 = vpop.f32.mrb[93].mxu0 }
 0x25f   : > { %v3089_v33 = vadd.f32 %v3088_v54, %v3087_v49  ;;  %v3090_v14 = vpop.f32.mrb[34].mxu1  ;;  %v4873_v62 = vpop.f32.mrb[94].mxu0 }
 0x260   : > { %v3091_v43 = vpop.f32.mrb[35].mxu1  ;;  %v4875_v2 = vpop.f32.mrb[95].mxu0 }
 0x261   : > { %v2092_v29 = vadd.f32 %v3089_v33, %v4869_v59  ;;  %v3092_v51 = vadd.f32 %v3091_v43, %v3090_v14 }
 0x263   : > { %v2253_v22 = vadd.f32 %v2252_v35, %v2092_v29  ;;  %v2095_v27 = vadd.f32 %v3092_v51, %v4869_v59  ;;  %v3364_v51 = vld [vmem:[%s3497_s4 + $0x20] sm:$0xff] }
 0x265   : > { %v2379_v32 = vadd.f32 %v3360_v28, %v2253_v22  ;;  %v2256_v42 = vadd.f32 %v2255_v16, %v2095_v27  ;;  %v3093_v24 = vpop.f32.mrb[36].mxu1 }
 0x266   : > { %v3094_v55 = vpop.f32.mrb[37].mxu1 }
 0x267   : > { %v2411_v18 = vmax.f32 %v2379_v32, 0.0  ;;  %v2380_v46 = vadd.f32 %v3361_v63, %v2256_v42  ;;  %v3095_v53 = vadd.f32 %v3094_v55, %v3093_v24  ;;  %v3096_v34 = vpop.f32.mrb[38].mxu1  ;;  %v3365_v24 = vld [vmem:[%s3497_s4 + $0x28] sm:$0xff] }
 0x268   : > { %v3097_v3 = vpop.f32.mrb[39].mxu1 }
 0x269   : > { %2443 = vst [vmem:[%s4885_s25] sm:$0xff] %v2411_v18  ;;  %v2412_v15 = vmax.f32 %v2380_v46, 0.0  ;;  %v2100_v17 = vadd.f32 %v3095_v53, %v4869_v59  ;;  %v3098_v39 = vadd.f32 %v3097_v3, %v3096_v34 }
 0x26b   : > { %2444 = vst [vmem:[%s4885_s25 + $0x8] sm:$0xff] %v2412_v15  ;;  %v2261_v45 = vadd.f32 %v3273_v26, %v2100_v17  ;;  %v2103_v47 = vadd.f32 %v3098_v39, %v4869_v59  ;;  %v3366_v15 = vld [vmem:[%s3497_s4 + $0x30] sm:$0xff] }
 0x26d   : > { %v2381_v5 = vadd.f32 %v3362_v50, %v2261_v45  ;;  %v2264_v56 = vadd.f32 %v4810_v38, %v2103_v47  ;;  %v3099_v1 = vpop.f32.mrb[40].mxu1 }
 0x26e   : > { %v3100_v35 = vpop.f32.mrb[41].mxu1 }
 0x26f   : > { %v2413_v16 = vmax.f32 %v2381_v5, 0.0  ;;  %v2382_v4 = vadd.f32 %v3363_v11, %v2264_v56  ;;  %v3101_v49 = vadd.f32 %v3100_v35, %v3099_v1  ;;  %v3102_v54 = vpop.f32.mrb[42].mxu1  ;;  %v3367_v5 = vld [vmem:[%s3497_s4 + $0x38] sm:$0xff] }
 0x270   : > { %v3103_v33 = vpop.f32.mrb[43].mxu1 }
 0x271   : > { %2445 = vst [vmem:[%s4885_s25 + $0x10] sm:$0xff] %v2413_v16  ;;  %v2414_v14 = vmax.f32 %v2382_v4, 0.0  ;;  %v2108_v26 = vadd.f32 %v3101_v49, %v4869_v59  ;;  %v3104_v43 = vadd.f32 %v3103_v33, %v3102_v54  ;;  %v3368_v54 = vld [vmem:[%s3497_s4 + $0x40] sm:$0xff] }
 0x273   : > { %2446 = vst [vmem:[%s4885_s25 + $0x18] sm:$0xff] %v2414_v14  ;;  %v2269_v29 = vadd.f32 %v4818_v6, %v2108_v26  ;;  %v2111_v38 = vadd.f32 %v3104_v43, %v4869_v59 }
 0x275   : > { %v2383_v22 = vadd.f32 %v3364_v51, %v2269_v29  ;;  %v2272_v27 = vadd.f32 %v4822_v44, %v2111_v38  ;;  %v3105_v28 = vpop.f32.mrb[44].mxu1  ;;  %v3369_v38 = vld [vmem:[%s3497_s4 + $0x48] sm:$0xff] }
 0x276   : > { %v3106_v32 = vpop.f32.mrb[45].mxu1 }
 0x277   : > { %v2415_v42 = vmax.f32 %v2383_v22, 0.0  ;;  %v2384_v55 = vadd.f32 %v3365_v24, %v2272_v27  ;;  %v3107_v18 = vadd.f32 %v3106_v32, %v3105_v28  ;;  %v3108_v63 = vpop.f32.mrb[46].mxu1 }
 0x278   : > { %v3109_v46 = vpop.f32.mrb[47].mxu1 }
 0x279   : > { %2447 = vst [vmem:[%s4885_s25 + $0x20] sm:$0xff] %v2415_v42  ;;  %v2416_v53 = vmax.f32 %v2384_v55, 0.0  ;;  %v2116_v6 = vadd.f32 %v3107_v18, %v4869_v59  ;;  %v3110_v34 = vadd.f32 %v3109_v46, %v3108_v63  ;;  %v3370_v55 = vld [vmem:[%s3497_s4 + $0x50] sm:$0xff] }
 0x27b   : > { %2448 = vst [vmem:[%s4885_s25 + $0x28] sm:$0xff] %v2416_v53  ;;  %v2277_v3 = vadd.f32 %v4816_v30, %v2116_v6  ;;  %v2119_v44 = vadd.f32 %v3110_v34, %v4869_v59  ;;  %v3371_v34 = vld [vmem:[%s3497_s4 + $0x58] sm:$0xff] }
 0x27d   : > { %v2385_v17 = vadd.f32 %v3366_v15, %v2277_v3  ;;  %v2280_v39 = vadd.f32 %v4820_v60, %v2119_v44  ;;  %v3111_v45 = vpop.f32.mrb[48].mxu1 }
 0x27e   : > { %v3112_v47 = vpop.f32.mrb[49].mxu1 }
 0x27f   : > { %v2417_v50 = vmax.f32 %v2385_v17, 0.0  ;;  %v2386_v56 = vadd.f32 %v3367_v5, %v2280_v39  ;;  %v3113_v1 = vadd.f32 %v3112_v47, %v3111_v45  ;;  %v3114_v35 = vpop.f32.mrb[50].mxu1 }
 0x280   : > { %v3115_v16 = vpop.f32.mrb[51].mxu1 }
 0x281   : > { %2449 = vst [vmem:[%s4885_s25 + $0x30] sm:$0xff] %v2417_v50  ;;  %v2418_v11 = vmax.f32 %v2386_v56, 0.0  ;;  %v2124_v30 = vadd.f32 %v3113_v1, %v4869_v59  ;;  %v3116_v4 = vadd.f32 %v3115_v16, %v3114_v35  ;;  %v3372_v50 = vld [vmem:[%s3497_s4 + $0x60] sm:$0xff] }
 0x283   : > { %2450 = vst [vmem:[%s4885_s25 + $0x38] sm:$0xff] %v2418_v11  ;;  %v2285_v49 = vadd.f32 %v4826_v61, %v2124_v30  ;;  %v2127_v60 = vadd.f32 %v3116_v4, %v4869_v59  ;;  %v3373_v11 = vld [vmem:[%s3497_s4 + $0x68] sm:$0xff] }
 0x285   : > { %v2387_v33 = vadd.f32 %v3368_v54, %v2285_v49  ;;  %v2288_v14 = vadd.f32 %v4830_v40, %v2127_v60  ;;  %v3117_v26 = vpop.f32.mrb[52].mxu1 }
 0x286   : > { %v3118_v43 = vpop.f32.mrb[53].mxu1 }
 0x287   : > { %v2419_v29 = vmax.f32 %v2387_v33, 0.0  ;;  %v2388_v51 = vadd.f32 %v3369_v38, %v2288_v14  ;;  %v3119_v22 = vadd.f32 %v3118_v43, %v3117_v26  ;;  %v3120_v27 = vpop.f32.mrb[54].mxu1  ;;  %v3374_v26 = vld [vmem:[%s3497_s4 + $0x70] sm:$0xff] }
 0x288   : > { %v3121_v28 = vpop.f32.mrb[55].mxu1 }
 0x289   : > { %2451 = vst [vmem:[%s4885_s25 + $0x40] sm:$0xff] %v2419_v29  ;;  %v2420_v32 = vmax.f32 %v2388_v51, 0.0  ;;  %v2132_v61 = vadd.f32 %v3119_v22, %v4869_v59  ;;  %v3122_v42 = vadd.f32 %v3121_v28, %v3120_v27  ;;  %v3375_v27 = vld [vmem:[%s3497_s4 + $0x78] sm:$0xff] }
 0x28b   : > { %2452 = vst [vmem:[%s4885_s25 + $0x48] sm:$0xff] %v2420_v32  ;;  %v2293_v24 = vadd.f32 %v4824_v57, %v2132_v61  ;;  %v2135_v40 = vadd.f32 %v3122_v42, %v4869_v59 }
 0x28d   : > { %v2389_v18 = vadd.f32 %v3370_v55, %v2293_v24  ;;  %v2296_v63 = vadd.f32 %v4828_v36, %v2135_v40  ;;  %v3123_v46 = vpop.f32.mrb[56].mxu1 }
 0x28e   : > { %v3124_v53 = vpop.f32.mrb[57].mxu1 }
 0x28f   : > { %v2421_v6 = vmax.f32 %v2389_v18, 0.0  ;;  %v2390_v3 = vadd.f32 %v3371_v34, %v2296_v63  ;;  %v3125_v44 = vadd.f32 %v3124_v53, %v3123_v46  ;;  %v3126_v15 = vpop.f32.mrb[58].mxu1  ;;  %v3376_v18 = vld [vmem:[%s3497_s4 + $0x80] sm:$0xff] }
 0x290   : > { %v3127_v17 = vpop.f32.mrb[59].mxu1 }
 0x291   : > { %2453 = vst [vmem:[%s4885_s25 + $0x50] sm:$0xff] %v2421_v6  ;;  %v2422_v39 = vmax.f32 %v2390_v3, 0.0  ;;  %v2140_v57 = vadd.f32 %v3125_v44, %v4869_v59  ;;  %v3128_v45 = vadd.f32 %v3127_v17, %v3126_v15  ;;  %v3377_v3 = vld [vmem:[%s3497_s4 + $0x88] sm:$0xff] }
 0x293   : > { %2454 = vst [vmem:[%s4885_s25 + $0x58] sm:$0xff] %v2422_v39  ;;  %v2301_v47 = vadd.f32 %v4834_v21, %v2140_v57  ;;  %v2143_v36 = vadd.f32 %v3128_v45, %v4869_v59 }
 0x295   : > { %v2391_v5 = vadd.f32 %v3372_v50, %v2301_v47  ;;  %v2304_v56 = vadd.f32 %v4838_v8, %v2143_v36  ;;  %v3129_v1 = vpop.f32.mrb[60].mxu1  ;;  %v3378_v36 = vld [vmem:[%s3497_s4 + $0x90] sm:$0xff] }
 0x296   : > { %v3130_v35 = vpop.f32.mrb[61].mxu1 }
 0x297   : > { %v2423_v16 = vmax.f32 %v2391_v5, 0.0  ;;  %v2392_v30 = vadd.f32 %v3373_v11, %v2304_v56  ;;  %v3131_v4 = vadd.f32 %v3130_v35, %v3129_v1  ;;  %v3132_v49 = vpop.f32.mrb[62].mxu1 }
 0x298   : > { %v3133_v60 = vpop.f32.mrb[63].mxu1 }
 0x299   : > { %2455 = vst [vmem:[%s4885_s25 + $0x60] sm:$0xff] %v2423_v16  ;;  %v2424_v54 = vmax.f32 %v2392_v30, 0.0  ;;  %v2148_v21 = vadd.f32 %v3131_v4, %v4869_v59  ;;  %v3134_v33 = vadd.f32 %v3133_v60, %v3132_v49  ;;  %v3379_v16 = vld [vmem:[%s3497_s4 + $0x98] sm:$0xff] }
 0x29b   : > { %2456 = vst [vmem:[%s4885_s25 + $0x68] sm:$0xff] %v2424_v54  ;;  %v2309_v14 = vadd.f32 %v4832_v9, %v2148_v21  ;;  %v2151_v8 = vadd.f32 %v3134_v33, %v4869_v59  ;;  %v3380_v33 = vld [vmem:[%s3497_s4 + $0xa0] sm:$0xff] }
 0x29d   : > { %v2393_v43 = vadd.f32 %v3374_v26, %v2309_v14  ;;  %v2312_v29 = vadd.f32 %v4836_v7, %v2151_v8  ;;  %v3135_v38 = vpop.f32.mrb[64].mxu1 }
 0x29e   : > { %v3136_v51 = vpop.f32.mrb[65].mxu1 }
 0x29f   : > { %v2425_v22 = vmax.f32 %v2393_v43, 0.0  ;;  %v2394_v28 = vadd.f32 %v3375_v27, %v2312_v29  ;;  %v3137_v32 = vadd.f32 %v3136_v51, %v3135_v38  ;;  %v3138_v61 = vpop.f32.mrb[66].mxu1  ;;  %v3381_v38 = vld [vmem:[%s3497_s4 + $0xa8] sm:$0xff] }
 0x2a0   : > { %v3139_v42 = vpop.f32.mrb[67].mxu1 }
 0x2a1   : > { %2457 = vst [vmem:[%s4885_s25 + $0x70] sm:$0xff] %v2425_v22  ;;  %v2426_v24 = vmax.f32 %v2394_v28, 0.0  ;;  %v2156_v9 = vadd.f32 %v3137_v32, %v4869_v59  ;;  %v3140_v40 = vadd.f32 %v3139_v42, %v3138_v61 }
 0x2a3   : > { %2458 = vst [vmem:[%s4885_s25 + $0x78] sm:$0xff] %v2426_v24  ;;  %v2317_v55 = vadd.f32 %v4842_v20, %v2156_v9  ;;  %v2159_v7 = vadd.f32 %v3140_v40, %v4869_v59  ;;  %v3382_v24 = vld [vmem:[%s3497_s4 + $0xb0] sm:$0xff] }
 0x2a5   : > { %v2395_v63 = vadd.f32 %v3376_v18, %v2317_v55  ;;  %v2320_v46 = vadd.f32 %v4846_v0, %v2159_v7  ;;  %v3141_v53 = vpop.f32.mrb[68].mxu1 }
 0x2a6   : > { %v3142_v6 = vpop.f32.mrb[69].mxu1 }
 0x2a7   : > { %v2427_v34 = vmax.f32 %v2395_v63, 0.0  ;;  %v2396_v44 = vadd.f32 %v3377_v3, %v2320_v46  ;;  %v3143_v15 = vadd.f32 %v3142_v6, %v3141_v53  ;;  %v3144_v17 = vpop.f32.mrb[70].mxu1  ;;  %v3383_v63 = vld [vmem:[%s3497_s4 + $0xb8] sm:$0xff] }
 0x2a8   : > { %v3145_v39 = vpop.f32.mrb[71].mxu1 }
 0x2a9   : > { %2459 = vst [vmem:[%s4885_s25 + $0x80] sm:$0xff] %v2427_v34  ;;  %v2428_v57 = vmax.f32 %v2396_v44, 0.0  ;;  %v2164_v20 = vadd.f32 %v3143_v15, %v4869_v59  ;;  %v3146_v45 = vadd.f32 %v3145_v39, %v3144_v17  ;;  %v3384_v17 = vld [vmem:[%s3497_s4 + $0xc0] sm:$0xff] }
 0x2ab   : > { %2460 = vst [vmem:[%s4885_s25 + $0x88] sm:$0xff] %v2428_v57  ;;  %v2325_v47 = vadd.f32 %v4840_v23, %v2164_v20  ;;  %v2167_v0 = vadd.f32 %v3146_v45, %v4869_v59 }
 0x2ad   : > { %v2397_v50 = vadd.f32 %v3378_v36, %v2325_v47  ;;  %v2328_v5 = vadd.f32 %v4844_v58, %v2167_v0  ;;  %v3147_v56 = vpop.f32.mrb[72].mxu1  ;;  %v3385_v0 = vld [vmem:[%s3497_s4 + $0xc8] sm:$0xff] }
 0x2ae   : > { %v3148_v1 = vpop.f32.mrb[73].mxu1 }
 0x2af   : > { %v2429_v35 = vmax.f32 %v2397_v50, 0.0  ;;  %v2398_v11 = vadd.f32 %v3379_v16, %v2328_v5  ;;  %v3149_v30 = vadd.f32 %v3148_v1, %v3147_v56  ;;  %v3150_v4 = vpop.f32.mrb[74].mxu1 }
 0x2b0   : > { %v3151_v49 = vpop.f32.mrb[75].mxu1 }
 0x2b1   : > { %2461 = vst [vmem:[%s4885_s25 + $0x90] sm:$0xff] %v2429_v35  ;;  %v2430_v60 = vmax.f32 %v2398_v11, 0.0  ;;  %v2172_v23 = vadd.f32 %v3149_v30, %v4869_v59  ;;  %v3152_v54 = vadd.f32 %v3151_v49, %v3150_v4  ;;  %v3386_v11 = vld [vmem:[%s3497_s4 + $0xd0] sm:$0xff] }
 0x2b3   : > { %2462 = vst [vmem:[%s4885_s25 + $0x98] sm:$0xff] %v2430_v60  ;;  %v2333_v21 = vadd.f32 %v4850_v10, %v2172_v23  ;;  %v2175_v58 = vadd.f32 %v3152_v54, %v4869_v59  ;;  %v3387_v54 = vld [vmem:[%s3497_s4 + $0xd8] sm:$0xff] }
 0x2b5   : > { %v2399_v14 = vadd.f32 %v3380_v33, %v2333_v21  ;;  %v2336_v8 = vadd.f32 %v4854_v41, %v2175_v58  ;;  %v3153_v26 = vpop.f32.mrb[76].mxu1 }
 0x2b6   : > { %v3154_v43 = vpop.f32.mrb[77].mxu1 }
 0x2b7   : > { %v2431_v29 = vmax.f32 %v2399_v14, 0.0  ;;  %v2400_v51 = vadd.f32 %v3381_v38, %v2336_v8  ;;  %v3155_v22 = vadd.f32 %v3154_v43, %v3153_v26  ;;  %v3156_v27 = vpop.f32.mrb[78].mxu1 }
 0x2b8   : > { %v3157_v28 = vpop.f32.mrb[79].mxu1 }
 0x2b9   : > { %2463 = vst [vmem:[%s4885_s25 + $0xa0] sm:$0xff] %v2431_v29  ;;  %v2432_v32 = vmax.f32 %v2400_v51, 0.0  ;;  %v2180_v10 = vadd.f32 %v3155_v22, %v4869_v59  ;;  %v3158_v61 = vadd.f32 %v3157_v28, %v3156_v27  ;;  %v3388_v29 = vld [vmem:[%s3497_s4 + $0xe0] sm:$0xff] }
 0x2bb   : > { %2464 = vst [vmem:[%s4885_s25 + $0xa8] sm:$0xff] %v2432_v32  ;;  %v2341_v42 = vadd.f32 %v4848_v37, %v2180_v10  ;;  %v2183_v41 = vadd.f32 %v3158_v61, %v4869_v59  ;;  %v3389_v32 = vld [vmem:[%s3497_s4 + $0xe8] sm:$0xff] }
 0x2bd   : > { %v2401_v9 = vadd.f32 %v3382_v24, %v2341_v42  ;;  %v2344_v40 = vadd.f32 %v4852_v12, %v2183_v41  ;;  %v3159_v55 = vpop.f32.mrb[80].mxu1 }
 0x2be   : > { %v3160_v7 = vpop.f32.mrb[81].mxu1 }
 0x2bf   : > { %v2433_v18 = vmax.f32 %v2401_v9, 0.0  ;;  %v2402_v46 = vadd.f32 %v3383_v63, %v2344_v40  ;;  %v3161_v53 = vadd.f32 %v3160_v7, %v3159_v55  ;;  %v3162_v6 = vpop.f32.mrb[82].mxu1  ;;  %v3390_v55 = vld [vmem:[%s3497_s4 + $0xf0] sm:$0xff] }
 0x2c0   : > { %v3163_v34 = vpop.f32.mrb[83].mxu1 }
 0x2c1   : > { %2465 = vst [vmem:[%s4885_s25 + $0xb0] sm:$0xff] %v2433_v18  ;;  %v2434_v3 = vmax.f32 %v2402_v46, 0.0  ;;  %v2188_v37 = vadd.f32 %v3161_v53, %v4869_v59  ;;  %v3164_v44 = vadd.f32 %v3163_v34, %v3162_v6  ;;  %v3391_v46 = vld [vmem:[%s3497_s4 + $0xf8] sm:$0xff] }
 0x2c3   : > { %2466 = vst [vmem:[%s4885_s25 + $0xb8] sm:$0xff] %v2434_v3  ;;  %v2349_v15 = vadd.f32 %v4858_v52, %v2188_v37  ;;  %v2191_v12 = vadd.f32 %v3164_v44, %v4869_v59 }
 0x2c5   : > { %v2403_v39 = vadd.f32 %v3384_v17, %v2349_v15  ;;  %v2352_v57 = vadd.f32 %v4862_v13, %v2191_v12  ;;  %v3165_v20 = vpop.f32.mrb[84].mxu1 }
 0x2c6   : > { %v3166_v45 = vpop.f32.mrb[85].mxu1 }
 0x2c7   : > { %v2435_v47 = vmax.f32 %v2403_v39, 0.0  ;;  %v2404_v36 = vadd.f32 %v3385_v0, %v2352_v57  ;;  %v3167_v50 = vadd.f32 %v3166_v45, %v3165_v20  ;;  %v3168_v5 = vpop.f32.mrb[86].mxu1 }
 0x2c8   : > { %v3169_v56 = vpop.f32.mrb[87].mxu1 }
 0x2c9   : > { %2467 = vst [vmem:[%s4885_s25 + $0xc0] sm:$0xff] %v2435_v47  ;;  %v2436_v1 = vmax.f32 %v2404_v36, 0.0  ;;  %v2196_v52 = vadd.f32 %v3167_v50, %v4869_v59  ;;  %v3170_v35 = vadd.f32 %v3169_v56, %v3168_v5 }
 0x2cb   : > { %2468 = vst [vmem:[%s4885_s25 + $0xc8] sm:$0xff] %v2436_v1  ;;  %v2357_v16 = vadd.f32 %v4856_v31, %v2196_v52  ;;  %v2199_v13 = vadd.f32 %v3170_v35, %v4869_v59 }
 0x2cd   : > { %v2405_v30 = vadd.f32 %v3386_v11, %v2357_v16  ;;  %v2360_v4 = vadd.f32 %v4860_v25, %v2199_v13  ;;  %v3171_v49 = vpop.f32.mrb[88].mxu1 }
 0x2ce   : > { %v3172_v60 = vpop.f32.mrb[89].mxu1 }
 0x2cf   : > { %v2437_v23 = vmax.f32 %v2405_v30, 0.0  ;;  %v2406_v21 = vadd.f32 %v3387_v54, %v2360_v4  ;;  %v3173_v58 = vadd.f32 %v3172_v60, %v3171_v49  ;;  %v3174_v33 = vpop.f32.mrb[90].mxu1 }
 0x2d0   : > { %v3175_v14 = vpop.f32.mrb[91].mxu1 }
 0x2d1   : > { %2469 = vst [vmem:[%s4885_s25 + $0xd0] sm:$0xff] %v2437_v23  ;;  %v2438_v8 = vmax.f32 %v2406_v21, 0.0  ;;  %v2204_v31 = vadd.f32 %v3173_v58, %v4869_v59  ;;  %v3176_v26 = vadd.f32 %v3175_v14, %v3174_v33 }
 0x2d3   : > { %2470 = vst [vmem:[%s4885_s25 + $0xd8] sm:$0xff] %v2438_v8  ;;  %v2365_v43 = vadd.f32 %v4871_v19, %v2204_v31  ;;  %v2207_v25 = vadd.f32 %v3176_v26, %v4869_v59 }
 0x2d5   : > { %v2407_v38 = vadd.f32 %v3388_v29, %v2365_v43  ;;  %v2368_v51 = vadd.f32 %v4875_v2, %v2207_v25  ;;  %v3177_v22 = vpop.f32.mrb[92].mxu1 }
 0x2d6   : > { %v3178_v27 = vpop.f32.mrb[93].mxu1 }
 0x2d7   : > { %v2439_v28 = vmax.f32 %v2407_v38, 0.0  ;;  %v2408_v10 = vadd.f32 %v3389_v32, %v2368_v51  ;;  %v3179_v61 = vadd.f32 %v3178_v27, %v3177_v22  ;;  %v3180_v42 = vpop.f32.mrb[94].mxu1 }
 0x2d8   : > { %v3181_v41 = vpop.f32.mrb[95].mxu1 }
 0x2d9   : > { %2471 = vst [vmem:[%s4885_s25 + $0xe0] sm:$0xff] %v2439_v28  ;;  %v2440_v19 = vmax.f32 %v2408_v10, 0.0  ;;  %v2212_v24 = vadd.f32 %v3179_v61, %v4869_v59  ;;  %v3182_v9 = vadd.f32 %v3181_v41, %v3180_v42 }
 0x2db   : > { %2472 = vst [vmem:[%s4885_s25 + $0xe8] sm:$0xff] %v2440_v19  ;;  %v2373_v2 = vadd.f32 %v4864_v48, %v2212_v24  ;;  %v2215_v40 = vadd.f32 %v3182_v9, %v4869_v59 }
 0x2dd   : > { %v2409_v7 = vadd.f32 %v3390_v55, %v2373_v2  ;;  %v2376_v18 = vadd.f32 %v4873_v62, %v2215_v40 }
 0x2df   : > { %v2441_v63 = vmax.f32 %v2409_v7, 0.0  ;;  %v2410_v53 = vadd.f32 %v3391_v46, %v2376_v18 }
 0x2e1   : > { %2473 = vst [vmem:[%s4885_s25 + $0xf0] sm:$0xff] %v2441_v63  ;;  %v2442_v6 = vmax.f32 %v2410_v53, 0.0 }
 0x2e3   : > { %2474 = vst [vmem:[%s4885_s25 + $0xf8] sm:$0xff] %v2442_v6 }
 0x2e4 PF: > { %s13_s12 = sadd.s32 1, %s3398_s12  }
 0x2e5   : > { %p10_p4 = scmp.ge.s32.totalorder %s13_s12, 6  }
 0x2e7   :  { %12 = sbr.rel (!%p10_p4) target bundleno = 1 (0x1), region = 64 }

</bundles_post_ra>
